<compile_context>
chip_gen: v7x
topology: tpu7x:2x2x1
jax: 0.10.0
libtpu: 0.0.40
codegen_flags: <defaults>
</compile_context>

<pallas_src>
import jax
import jax.numpy as jnp
from jax import lax
from jax.experimental import pallas as pl
from jax.experimental.pallas import tpu as pltpu

# ----- model dimensions (small, consistent with the module's forward) -----
B, L, V = 2, 16, 50     # batch, seq_len, vocab
E = 32                  # embedding dim (shared by cnn & rnn embeddings)
H = 32                  # LSTM hidden size  (bidirectional -> 2H features)
K = 3                   # conv filter height (over the sequence axis)
F = 64                  # number of conv filters
C = 2                   # class_num
D = F + 2 * H           # classifier in_features
P = L - K + 1           # conv output length per sequence
LC = B * L - K + 1      # conv output length over the flat batch-major sequence


def _full_spec(shape):
    # whole-array block; grid=(1,) so index_map always returns block 0
    return pl.BlockSpec(shape, lambda i, _n=len(shape): (0,) * _n)


# --------------------------------------------------------------------------
# Fused kernel: embed -> {BiLSTM last, Conv+ReLU+MaxPool} -> Linear -> CE loss
# --------------------------------------------------------------------------
def _fused_kernel(ids_tm_ref, ids_bm_ref, labels_ref,
                  emb_r_ref, emb_c_ref,
                  wih_f_ref, whh_f_ref, b_f_ref,
                  wih_b_ref, b_b_ref,
                  conv_w_ref, conv_b_ref,
                  clf_w_ref, clf_b_ref,
                  logits_ref, loss_ref):
    f32 = jnp.float32

    # ---- in-kernel embedding gather via one-hot matmul (V is tiny) ----
    # ids_tm: (L*B,1) time-major flat (row t*B+b) for the LSTM branch
    # ids_bm: (B*L,1) batch-major flat (row b*L+t) for the CNN branch
    onehot_tm = (lax.broadcasted_iota(jnp.int32, (L * B, V), 1)
                 == ids_tm_ref[...]).astype(f32)
    onehot_bm = (lax.broadcasted_iota(jnp.int32, (B * L, V), 1)
                 == ids_bm_ref[...]).astype(f32)
    x_rnn = jnp.dot(onehot_tm, emb_r_ref[...], preferred_element_type=f32)  # (L*B,E)
    x_cnn = jnp.dot(onehot_bm, emb_c_ref[...], preferred_element_type=f32)  # (B*L,E)

    # gate nonlinearity: i,f,o -> sigmoid, g -> tanh; hoisted lane mask,
    # full-vreg EUP work + one VPU select (no pre-activation lane slicing).
    lane = lax.broadcasted_iota(jnp.int32, (B, 4 * H), 1)
    is_g = (lane >= 2 * H) & (lane < 3 * H)

    def lstm_act(gates):
        return jnp.where(is_g, jnp.tanh(gates), jax.nn.sigmoid(gates))

    # ---- backward direction: exactly one cell step from zeros on x[L-1] ----
    # (PyTorch bidirectional semantics for output[:, -1, H:]).  h0 = c0 = 0,
    # so the h0 @ W_hh_b and f*c0 terms vanish exactly (W_hh_b not needed).
    x_last = x_rnn[(L - 1) * B:L * B, :]                                   # (B,E)
    gates_b = (jnp.dot(x_last, wih_b_ref[...], preferred_element_type=f32)
               + b_b_ref[...])                                             # (B,4H)
    act_b = lstm_act(gates_b)
    h_bwd = act_b[:, 3 * H:4 * H] * jnp.tanh(
        act_b[:, 0:H] * act_b[:, 2 * H:3 * H])                             # (B,H)

    # ---- CNN branch: conv over the flat sequence + ReLU + per-batch max ----
    # Convolve the whole flat (B*L, E) sequence in K batched matmuls; rows
    # that straddle a batch boundary are excluded from the max pool below.
    acc = jnp.zeros((LC, F), f32)
    for j in range(K):
        acc = acc + jnp.dot(x_cnn[j:j + LC, :], conv_w_ref[j],
                            preferred_element_type=f32)
    relu = jnp.maximum(acc + conv_b_ref[...], 0.0)                         # (LC,F)
    cnn_feat = jnp.concatenate(
        [jnp.max(relu[b * L:b * L + P, :], axis=0, keepdims=True)
         for b in range(B)], axis=0)                                       # (B,F)

    # ---- forward LSTM: hoisted input projection + unrolled recurrence ----
    xproj = (jnp.dot(x_rnn, wih_f_ref[...], preferred_element_type=f32)
             + b_f_ref[...])                                               # (L*B,4H)
    whh_f = whh_f_ref[...]                                                 # (H,4H)
    h = jnp.zeros((B, H), f32)
    c = jnp.zeros((B, H), f32)
    for t in range(L):                       # static unroll (L=16, fixed)
        gates = xproj[t * B:(t + 1) * B, :] + jnp.dot(
            h, whh_f, preferred_element_type=f32)                          # (B,4H)
        act = lstm_act(gates)
        c = act[:, H:2 * H] * c + act[:, 0:H] * act[:, 2 * H:3 * H]
        h = act[:, 3 * H:4 * H] * jnp.tanh(c)
    h_fwd = h                                                              # (B,H)

    # ---- classifier (split matmul; no feature concat) + CrossEntropyLoss ----
    # TODO(synk): dropout treated as identity (eval mode); training-mode RNG
    #             dropout is not implemented.
    w_all = clf_w_ref[...]                                                 # (D,C)
    logits = (jnp.dot(cnn_feat, w_all[0:F, :], preferred_element_type=f32)
              + jnp.dot(h_fwd, w_all[F:F + H, :], preferred_element_type=f32)
              + jnp.dot(h_bwd, w_all[F + H:D, :], preferred_element_type=f32)
              + clf_b_ref[...])                                            # (B,C)
    logits_ref[...] = logits

    m = jnp.max(logits, axis=1, keepdims=True)
    z = logits - m
    lse = jnp.log(jnp.sum(jnp.exp(z), axis=1, keepdims=True))
    logp = z - lse                                                         # (B,C)
    onehot_lbl = (lax.broadcasted_iota(jnp.int32, (B, C), 1)
                  == labels_ref[...]).astype(f32)
    nll = -jnp.sum(logp * onehot_lbl, axis=1, keepdims=True)               # (B,1)
    loss_ref[...] = jnp.sum(nll, axis=0, keepdims=True) * (1.0 / B)


def birnn_c_fused(params, ids_tm, ids_bm, labels_2d):
    args = (ids_tm, ids_bm, labels_2d,
            params["emb_R"], params["emb_C"],
            params["wih_f"], params["whh_f"], params["b_f"],
            params["wih_b"], params["b_b"],
            params["conv_w"], params["conv_b"],
            params["clf_w"], params["clf_b"])
    return pl.pallas_call(
        _fused_kernel,
        out_shape=(jax.ShapeDtypeStruct((B, C), jnp.float32),
                   jax.ShapeDtypeStruct((1, 1), jnp.float32)),
        grid=(1,),
        in_specs=[_full_spec(a.shape) for a in args],
        out_specs=[_full_spec((B, C)), _full_spec((1, 1))],
        compiler_params=pltpu.CompilerParams(
            dimension_semantics=("arbitrary",)),
    )(*args)


# --------------------------------------------------------------------------
# Parameter init (deterministic; replaces the torch.load checkpoints)
# --------------------------------------------------------------------------
def init_params(key):
    ks = jax.random.split(key, 13)
    s = 0.1
    n = lambda k, shape: (jax.random.normal(k, shape, jnp.float32) * s)
    return {
        "emb_R":  n(ks[0], (V, E)),
        "emb_C":  n(ks[1], (V, E)),
        # LSTM (PyTorch gate order i, f, g, o along the 4H axis), weights
        # stored transposed; bias = b_ih + b_hh pre-summed.
        "wih_f":  n(ks[2], (E, 4 * H)),
        "whh_f":  n(ks[3], (H, 4 * H)),
        "b_f":    n(ks[4], (1, 4 * H)),
        "wih_b":  n(ks[5], (E, 4 * H)),
        # whh_b exists in the module but contributes exactly 0 to
        # output[:, -1, H:] (backward h0 = 0), so the kernel never reads it.
        "whh_b":  n(ks[6], (H, 4 * H)),
        "b_b":    n(ks[7], (1, 4 * H)),
        # Conv2d(1, F, (K, E)) weight (F,1,K,E) stored as (K, E, F)
        "conv_w": n(ks[8], (K, E, F)),
        "conv_b": n(ks[9], (1, F)),
        # classifier Linear(D, C) stored as (D, C); rows ordered
        # [cnn features (F), rnn forward (H), rnn backward (H)]
        "clf_w":  n(ks[10], (D, C)),
        "clf_b":  n(ks[11], (1, C)),
    }


# --------------------------------------------------------------------------
# Full forward (only trivial int reshapes remain outside the kernel)
# --------------------------------------------------------------------------
def birnn_c_forward(params, input_ids, labels):
    ids = input_ids.astype(jnp.int32)
    ids_tm = ids.T.reshape(L * B, 1)       # time-major flat:  row t*B + b
    ids_bm = ids.reshape(B * L, 1)         # batch-major flat: row b*L + t
    labels_2d = labels.astype(jnp.int32).reshape(B, 1)
    logits, loss = birnn_c_fused(params, ids_tm, ids_bm, labels_2d)
    return loss[0, 0], logits, labels


if __name__ == "__main__":
    key = jax.random.PRNGKey(0)
    k_param, k_ids, k_lbl = jax.random.split(key, 3)

    params = init_params(k_param)
    input_ids = jax.random.randint(k_ids, (B, L), 0, V, dtype=jnp.int32)
    labels = jax.random.randint(k_lbl, (B,), 0, C, dtype=jnp.int32)

    loss, logits, labels_out = jax.jit(birnn_c_forward)(params, input_ids, labels)
    jax.block_until_ready((loss, logits, labels_out))

    assert logits.shape == (B, C)
    assert loss.shape == ()
    print("KERNEL_OK")
</pallas_src>

<mosaic_0001>
module attributes {stable_mosaic.version = 11 : i64} {
  func.func @_fused_kernel(%arg0: i32, %arg1: memref<32x1xi32, #tpu.memory_space<vmem>>, %arg2: memref<32x1xi32, #tpu.memory_space<vmem>>, %arg3: memref<2x1xi32, #tpu.memory_space<vmem>>, %arg4: memref<50x32xf32, #tpu.memory_space<vmem>>, %arg5: memref<50x32xf32, #tpu.memory_space<vmem>>, %arg6: memref<32x128xf32, #tpu.memory_space<vmem>>, %arg7: memref<32x128xf32, #tpu.memory_space<vmem>>, %arg8: memref<1x128xf32, #tpu.memory_space<vmem>>, %arg9: memref<32x128xf32, #tpu.memory_space<vmem>>, %arg10: memref<1x128xf32, #tpu.memory_space<vmem>>, %arg11: memref<3x32x64xf32, #tpu.memory_space<vmem>>, %arg12: memref<1x64xf32, #tpu.memory_space<vmem>>, %arg13: memref<128x2xf32, #tpu.memory_space<vmem>>, %arg14: memref<1x2xf32, #tpu.memory_space<vmem>>, %arg15: memref<2x2xf32, #tpu.memory_space<vmem>>, %arg16: memref<1x1xf32, #tpu.memory_space<vmem>>) attributes {dimension_semantics = [#tpu.dimension_semantics<arbitrary>], iteration_bounds = array<i64: 1>, scalar_prefetch = 0 : i64, scratch_operands = 0 : i64, tpu.core_type = #tpu.core_type<tc>, window_params = [{pipeline_mode = #tpu.pipeline_mode<synchronous>, transform_indices = @transform_0, window_bounds = array<i64: 32, 1>}, {pipeline_mode = #tpu.pipeline_mode<synchronous>, transform_indices = @transform_1, window_bounds = array<i64: 32, 1>}, {pipeline_mode = #tpu.pipeline_mode<synchronous>, transform_indices = @transform_2, window_bounds = array<i64: 2, 1>}, {pipeline_mode = #tpu.pipeline_mode<synchronous>, transform_indices = @transform_3, window_bounds = array<i64: 50, 32>}, {pipeline_mode = #tpu.pipeline_mode<synchronous>, transform_indices = @transform_4, window_bounds = array<i64: 50, 32>}, {pipeline_mode = #tpu.pipeline_mode<synchronous>, transform_indices = @transform_5, window_bounds = array<i64: 32, 128>}, {pipeline_mode = #tpu.pipeline_mode<synchronous>, transform_indices = @transform_6, window_bounds = array<i64: 32, 128>}, {pipeline_mode = #tpu.pipeline_mode<synchronous>, transform_indices = @transform_7, window_bounds = array<i64: 1, 128>}, {pipeline_mode = #tpu.pipeline_mode<synchronous>, transform_indices = @transform_8, window_bounds = array<i64: 32, 128>}, {pipeline_mode = #tpu.pipeline_mode<synchronous>, transform_indices = @transform_9, window_bounds = array<i64: 1, 128>}, {pipeline_mode = #tpu.pipeline_mode<synchronous>, transform_indices = @transform_10, window_bounds = array<i64: 3, 32, 64>}, {pipeline_mode = #tpu.pipeline_mode<synchronous>, transform_indices = @transform_11, window_bounds = array<i64: 1, 64>}, {pipeline_mode = #tpu.pipeline_mode<synchronous>, transform_indices = @transform_12, window_bounds = array<i64: 128, 2>}, {pipeline_mode = #tpu.pipeline_mode<synchronous>, transform_indices = @transform_13, window_bounds = array<i64: 1, 2>}, {pipeline_mode = #tpu.pipeline_mode<synchronous>, transform_indices = @transform_14, window_bounds = array<i64: 2, 2>}, {pipeline_mode = #tpu.pipeline_mode<synchronous>, transform_indices = @transform_15, window_bounds = array<i64: 1, 1>}]} {
    %0 = tpu.iota {dimensions = array<i32: 1>} : vector<32x50xi32>
    %c0 = arith.constant 0 : index
    %c0_0 = arith.constant 0 : index
    %1 = vector.load %arg1[%c0, %c0_0] : memref<32x1xi32, #tpu.memory_space<vmem>>, vector<32x1xi32>
    %2 = vector.broadcast %1 : vector<32x1xi32> to vector<32x50xi32>
    %3 = arith.cmpi eq, %0, %2 : vector<32x50xi32>
    %4 = arith.extui %3 : vector<32x50xi1> to vector<32x50xi32>
    %5 = arith.sitofp %4 : vector<32x50xi32> to vector<32x50xf32>
    %6 = tpu.iota {dimensions = array<i32: 1>} : vector<32x50xi32>
    %c0_1 = arith.constant 0 : index
    %c0_2 = arith.constant 0 : index
    %7 = vector.load %arg2[%c0_1, %c0_2] : memref<32x1xi32, #tpu.memory_space<vmem>>, vector<32x1xi32>
    %8 = vector.broadcast %7 : vector<32x1xi32> to vector<32x50xi32>
    %9 = arith.cmpi eq, %6, %8 : vector<32x50xi32>
    %10 = arith.extui %9 : vector<32x50xi1> to vector<32x50xi32>
    %11 = arith.sitofp %10 : vector<32x50xi32> to vector<32x50xf32>
    %c0_3 = arith.constant 0 : index
    %c0_4 = arith.constant 0 : index
    %12 = vector.load %arg4[%c0_3, %c0_4] : memref<50x32xf32, #tpu.memory_space<vmem>>, vector<50x32xf32>
    %cst = arith.constant dense<0.000000e+00> : vector<32x32xf32>
    %13 = tpu.matmul %5, %12, %cst {dimension_numbers = #tpu.dot_dimension_numbers<[1], [0], [0], [1], [0, 0, 1, 1], [], []>} : vector<32x50xf32>, vector<50x32xf32>, vector<32x32xf32> -> vector<32x32xf32>
    %c0_5 = arith.constant 0 : index
    %c0_6 = arith.constant 0 : index
    %14 = vector.load %arg5[%c0_5, %c0_6] : memref<50x32xf32, #tpu.memory_space<vmem>>, vector<50x32xf32>
    %cst_7 = arith.constant dense<0.000000e+00> : vector<32x32xf32>
    %15 = tpu.matmul %11, %14, %cst_7 {dimension_numbers = #tpu.dot_dimension_numbers<[1], [0], [0], [1], [0, 0, 1, 1], [], []>} : vector<32x50xf32>, vector<50x32xf32>, vector<32x32xf32> -> vector<32x32xf32>
    %16 = tpu.iota {dimensions = array<i32: 1>} : vector<2x128xi32>
    %c64_i32 = arith.constant 64 : i32
    %17 = vector.broadcast %c64_i32 : i32 to vector<2x128xi32>
    %18 = arith.cmpi sge, %16, %17 : vector<2x128xi32>
    %c96_i32 = arith.constant 96 : i32
    %19 = vector.broadcast %c96_i32 : i32 to vector<2x128xi32>
    %20 = arith.cmpi slt, %16, %19 : vector<2x128xi32>
    %21 = arith.andi %18, %20 : vector<2x128xi1>
    %22 = vector.extract_strided_slice %13 {offsets = [30, 0], sizes = [2, 32], strides = [1, 1]} : vector<32x32xf32> to vector<2x32xf32>
    %c0_8 = arith.constant 0 : index
    %c0_9 = arith.constant 0 : index
    %23 = vector.load %arg9[%c0_8, %c0_9] : memref<32x128xf32, #tpu.memory_space<vmem>>, vector<32x128xf32>
    %cst_10 = arith.constant dense<0.000000e+00> : vector<2x128xf32>
    %24 = tpu.matmul %22, %23, %cst_10 {dimension_numbers = #tpu.dot_dimension_numbers<[1], [0], [0], [1], [0, 0, 1, 1], [], []>} : vector<2x32xf32>, vector<32x128xf32>, vector<2x128xf32> -> vector<2x128xf32>
    %c0_11 = arith.constant 0 : index
    %c0_12 = arith.constant 0 : index
    %25 = vector.load %arg10[%c0_11, %c0_12] : memref<1x128xf32, #tpu.memory_space<vmem>>, vector<1x128xf32>
    %26 = vector.broadcast %25 : vector<1x128xf32> to vector<2x128xf32>
    %27 = arith.addf %24, %26 : vector<2x128xf32>
    %28 = math.tanh %27 : vector<2x128xf32>
    %29 = arith.negf %27 : vector<2x128xf32>
    %30 = math.exp %29 : vector<2x128xf32>
    %cst_13 = arith.constant 1.000000e+00 : f32
    %31 = vector.broadcast %cst_13 : f32 to vector<2x128xf32>
    %32 = arith.addf %31, %30 : vector<2x128xf32>
    %33 = arith.divf %31, %32 : vector<2x128xf32>
    %34 = arith.select %21, %28, %33 : vector<2x128xi1>, vector<2x128xf32>
    %35 = vector.extract_strided_slice %34 {offsets = [0, 96], sizes = [2, 32], strides = [1, 1]} : vector<2x128xf32> to vector<2x32xf32>
    %36 = vector.extract_strided_slice %34 {offsets = [0, 0], sizes = [2, 32], strides = [1, 1]} : vector<2x128xf32> to vector<2x32xf32>
    %37 = vector.extract_strided_slice %34 {offsets = [0, 64], sizes = [2, 32], strides = [1, 1]} : vector<2x128xf32> to vector<2x32xf32>
    %38 = arith.mulf %36, %37 : vector<2x32xf32>
    %39 = math.tanh %38 : vector<2x32xf32>
    %40 = arith.mulf %35, %39 : vector<2x32xf32>
    %cst_14 = arith.constant 0.000000e+00 : f32
    %41 = vector.broadcast %cst_14 : f32 to vector<30x64xf32>
    %42 = vector.extract_strided_slice %15 {offsets = [0, 0], sizes = [30, 32], strides = [1, 1]} : vector<32x32xf32> to vector<30x32xf32>
    %c0_15 = arith.constant 0 : index
    %c0_16 = arith.constant 0 : index
    %c0_17 = arith.constant 0 : index
    %43 = vector.load %arg11[%c0_15, %c0_16, %c0_17] : memref<3x32x64xf32, #tpu.memory_space<vmem>>, vector<1x32x64xf32>
    %44 = vector.shape_cast %43 : vector<1x32x64xf32> to vector<32x64xf32>
    %cst_18 = arith.constant dense<0.000000e+00> : vector<30x64xf32>
    %45 = tpu.matmul %42, %44, %cst_18 {dimension_numbers = #tpu.dot_dimension_numbers<[1], [0], [0], [1], [0, 0, 1, 1], [], []>} : vector<30x32xf32>, vector<32x64xf32>, vector<30x64xf32> -> vector<30x64xf32>
    %46 = arith.addf %41, %45 : vector<30x64xf32>
    %47 = vector.extract_strided_slice %15 {offsets = [1, 0], sizes = [30, 32], strides = [1, 1]} : vector<32x32xf32> to vector<30x32xf32>
    %c1 = arith.constant 1 : index
    %c0_19 = arith.constant 0 : index
    %c0_20 = arith.constant 0 : index
    %48 = vector.load %arg11[%c1, %c0_19, %c0_20] : memref<3x32x64xf32, #tpu.memory_space<vmem>>, vector<1x32x64xf32>
    %49 = vector.shape_cast %48 : vector<1x32x64xf32> to vector<32x64xf32>
    %cst_21 = arith.constant dense<0.000000e+00> : vector<30x64xf32>
    %50 = tpu.matmul %47, %49, %cst_21 {dimension_numbers = #tpu.dot_dimension_numbers<[1], [0], [0], [1], [0, 0, 1, 1], [], []>} : vector<30x32xf32>, vector<32x64xf32>, vector<30x64xf32> -> vector<30x64xf32>
    %51 = arith.addf %46, %50 : vector<30x64xf32>
    %52 = vector.extract_strided_slice %15 {offsets = [2, 0], sizes = [30, 32], strides = [1, 1]} : vector<32x32xf32> to vector<30x32xf32>
    %c2 = arith.constant 2 : index
    %c0_22 = arith.constant 0 : index
    %c0_23 = arith.constant 0 : index
    %53 = vector.load %arg11[%c2, %c0_22, %c0_23] : memref<3x32x64xf32, #tpu.memory_space<vmem>>, vector<1x32x64xf32>
    %54 = vector.shape_cast %53 : vector<1x32x64xf32> to vector<32x64xf32>
    %cst_24 = arith.constant dense<0.000000e+00> : vector<30x64xf32>
    %55 = tpu.matmul %52, %54, %cst_24 {dimension_numbers = #tpu.dot_dimension_numbers<[1], [0], [0], [1], [0, 0, 1, 1], [], []>} : vector<30x32xf32>, vector<32x64xf32>, vector<30x64xf32> -> vector<30x64xf32>
    %56 = arith.addf %51, %55 : vector<30x64xf32>
    %c0_25 = arith.constant 0 : index
    %c0_26 = arith.constant 0 : index
    %57 = vector.load %arg12[%c0_25, %c0_26] : memref<1x64xf32, #tpu.memory_space<vmem>>, vector<1x64xf32>
    %58 = vector.broadcast %57 : vector<1x64xf32> to vector<30x64xf32>
    %59 = arith.addf %56, %58 : vector<30x64xf32>
    %cst_27 = arith.constant 0.000000e+00 : f32
    %60 = vector.broadcast %cst_27 : f32 to vector<30x64xf32>
    %61 = arith.maximumf %59, %60 : vector<30x64xf32>
    %62 = vector.extract_strided_slice %61 {offsets = [0, 0], sizes = [14, 64], strides = [1, 1]} : vector<30x64xf32> to vector<14x64xf32>
    %cst_28 = arith.constant dense<0xFF800000> : vector<64xf32>
    %63 = vector.multi_reduction <maximumf>, %62, %cst_28 [0] : vector<14x64xf32> to vector<64xf32>
    %64 = vector.shape_cast %63 : vector<64xf32> to vector<1x64xf32>
    %65 = vector.extract_strided_slice %61 {offsets = [16, 0], sizes = [14, 64], strides = [1, 1]} : vector<30x64xf32> to vector<14x64xf32>
    %cst_29 = arith.constant dense<0xFF800000> : vector<64xf32>
    %66 = vector.multi_reduction <maximumf>, %65, %cst_29 [0] : vector<14x64xf32> to vector<64xf32>
    %67 = vector.shape_cast %66 : vector<64xf32> to vector<1x64xf32>
    %68 = tpu.concatenate %64, %67 in 0 : vector<1x64xf32>, vector<1x64xf32> -> vector<2x64xf32>
    %c0_30 = arith.constant 0 : index
    %c0_31 = arith.constant 0 : index
    %69 = vector.load %arg6[%c0_30, %c0_31] : memref<32x128xf32, #tpu.memory_space<vmem>>, vector<32x128xf32>
    %cst_32 = arith.constant dense<0.000000e+00> : vector<32x128xf32>
    %70 = tpu.matmul %13, %69, %cst_32 {dimension_numbers = #tpu.dot_dimension_numbers<[1], [0], [0], [1], [0, 0, 1, 1], [], []>} : vector<32x32xf32>, vector<32x128xf32>, vector<32x128xf32> -> vector<32x128xf32>
    %c0_33 = arith.constant 0 : index
    %c0_34 = arith.constant 0 : index
    %71 = vector.load %arg8[%c0_33, %c0_34] : memref<1x128xf32, #tpu.memory_space<vmem>>, vector<1x128xf32>
    %72 = vector.broadcast %71 : vector<1x128xf32> to vector<32x128xf32>
    %73 = arith.addf %70, %72 : vector<32x128xf32>
    %c0_35 = arith.constant 0 : index
    %c0_36 = arith.constant 0 : index
    %74 = vector.load %arg7[%c0_35, %c0_36] : memref<32x128xf32, #tpu.memory_space<vmem>>, vector<32x128xf32>
    %cst_37 = arith.constant 0.000000e+00 : f32
    %75 = vector.broadcast %cst_37 : f32 to vector<2x32xf32>
    %cst_38 = arith.constant 0.000000e+00 : f32
    %76 = vector.broadcast %cst_38 : f32 to vector<2x32xf32>
    %77 = vector.extract_strided_slice %73 {offsets = [0, 0], sizes = [2, 128], strides = [1, 1]} : vector<32x128xf32> to vector<2x128xf32>
    %cst_39 = arith.constant dense<0.000000e+00> : vector<2x128xf32>
    %78 = tpu.matmul %75, %74, %cst_39 {dimension_numbers = #tpu.dot_dimension_numbers<[1], [0], [0], [1], [0, 0, 1, 1], [], []>} : vector<2x32xf32>, vector<32x128xf32>, vector<2x128xf32> -> vector<2x128xf32>
    %79 = arith.addf %77, %78 : vector<2x128xf32>
    %80 = math.tanh %79 : vector<2x128xf32>
    %81 = arith.negf %79 : vector<2x128xf32>
    %82 = math.exp %81 : vector<2x128xf32>
    %cst_40 = arith.constant 1.000000e+00 : f32
    %83 = vector.broadcast %cst_40 : f32 to vector<2x128xf32>
    %84 = arith.addf %83, %82 : vector<2x128xf32>
    %85 = arith.divf %83, %84 : vector<2x128xf32>
    %86 = arith.select %21, %80, %85 : vector<2x128xi1>, vector<2x128xf32>
    %87 = vector.extract_strided_slice %86 {offsets = [0, 32], sizes = [2, 32], strides = [1, 1]} : vector<2x128xf32> to vector<2x32xf32>
    %88 = arith.mulf %87, %76 : vector<2x32xf32>
    %89 = vector.extract_strided_slice %86 {offsets = [0, 0], sizes = [2, 32], strides = [1, 1]} : vector<2x128xf32> to vector<2x32xf32>
    %90 = vector.extract_strided_slice %86 {offsets = [0, 64], sizes = [2, 32], strides = [1, 1]} : vector<2x128xf32> to vector<2x32xf32>
    %91 = arith.mulf %89, %90 : vector<2x32xf32>
    %92 = arith.addf %88, %91 : vector<2x32xf32>
    %93 = vector.extract_strided_slice %86 {offsets = [0, 96], sizes = [2, 32], strides = [1, 1]} : vector<2x128xf32> to vector<2x32xf32>
    %94 = math.tanh %92 : vector<2x32xf32>
    %95 = arith.mulf %93, %94 : vector<2x32xf32>
    %96 = vector.extract_strided_slice %73 {offsets = [2, 0], sizes = [2, 128], strides = [1, 1]} : vector<32x128xf32> to vector<2x128xf32>
    %cst_41 = arith.constant dense<0.000000e+00> : vector<2x128xf32>
    %97 = tpu.matmul %95, %74, %cst_41 {dimension_numbers = #tpu.dot_dimension_numbers<[1], [0], [0], [1], [0, 0, 1, 1], [], []>} : vector<2x32xf32>, vector<32x128xf32>, vector<2x128xf32> -> vector<2x128xf32>
    %98 = arith.addf %96, %97 : vector<2x128xf32>
    %99 = math.tanh %98 : vector<2x128xf32>
    %100 = arith.negf %98 : vector<2x128xf32>
    %101 = math.exp %100 : vector<2x128xf32>
    %cst_42 = arith.constant 1.000000e+00 : f32
    %102 = vector.broadcast %cst_42 : f32 to vector<2x128xf32>
    %103 = arith.addf %102, %101 : vector<2x128xf32>
    %104 = arith.divf %102, %103 : vector<2x128xf32>
    %105 = arith.select %21, %99, %104 : vector<2x128xi1>, vector<2x128xf32>
    %106 = vector.extract_strided_slice %105 {offsets = [0, 32], sizes = [2, 32], strides = [1, 1]} : vector<2x128xf32> to vector<2x32xf32>
    %107 = arith.mulf %106, %92 : vector<2x32xf32>
    %108 = vector.extract_strided_slice %105 {offsets = [0, 0], sizes = [2, 32], strides = [1, 1]} : vector<2x128xf32> to vector<2x32xf32>
    %109 = vector.extract_strided_slice %105 {offsets = [0, 64], sizes = [2, 32], strides = [1, 1]} : vector<2x128xf32> to vector<2x32xf32>
    %110 = arith.mulf %108, %109 : vector<2x32xf32>
    %111 = arith.addf %107, %110 : vector<2x32xf32>
    %112 = vector.extract_strided_slice %105 {offsets = [0, 96], sizes = [2, 32], strides = [1, 1]} : vector<2x128xf32> to vector<2x32xf32>
    %113 = math.tanh %111 : vector<2x32xf32>
    %114 = arith.mulf %112, %113 : vector<2x32xf32>
    %115 = vector.extract_strided_slice %73 {offsets = [4, 0], sizes = [2, 128], strides = [1, 1]} : vector<32x128xf32> to vector<2x128xf32>
    %cst_43 = arith.constant dense<0.000000e+00> : vector<2x128xf32>
    %116 = tpu.matmul %114, %74, %cst_43 {dimension_numbers = #tpu.dot_dimension_numbers<[1], [0], [0], [1], [0, 0, 1, 1], [], []>} : vector<2x32xf32>, vector<32x128xf32>, vector<2x128xf32> -> vector<2x128xf32>
    %117 = arith.addf %115, %116 : vector<2x128xf32>
    %118 = math.tanh %117 : vector<2x128xf32>
    %119 = arith.negf %117 : vector<2x128xf32>
    %120 = math.exp %119 : vector<2x128xf32>
    %cst_44 = arith.constant 1.000000e+00 : f32
    %121 = vector.broadcast %cst_44 : f32 to vector<2x128xf32>
    %122 = arith.addf %121, %120 : vector<2x128xf32>
    %123 = arith.divf %121, %122 : vector<2x128xf32>
    %124 = arith.select %21, %118, %123 : vector<2x128xi1>, vector<2x128xf32>
    %125 = vector.extract_strided_slice %124 {offsets = [0, 32], sizes = [2, 32], strides = [1, 1]} : vector<2x128xf32> to vector<2x32xf32>
    %126 = arith.mulf %125, %111 : vector<2x32xf32>
    %127 = vector.extract_strided_slice %124 {offsets = [0, 0], sizes = [2, 32], strides = [1, 1]} : vector<2x128xf32> to vector<2x32xf32>
    %128 = vector.extract_strided_slice %124 {offsets = [0, 64], sizes = [2, 32], strides = [1, 1]} : vector<2x128xf32> to vector<2x32xf32>
    %129 = arith.mulf %127, %128 : vector<2x32xf32>
    %130 = arith.addf %126, %129 : vector<2x32xf32>
    %131 = vector.extract_strided_slice %124 {offsets = [0, 96], sizes = [2, 32], strides = [1, 1]} : vector<2x128xf32> to vector<2x32xf32>
    %132 = math.tanh %130 : vector<2x32xf32>
    %133 = arith.mulf %131, %132 : vector<2x32xf32>
    %134 = vector.extract_strided_slice %73 {offsets = [6, 0], sizes = [2, 128], strides = [1, 1]} : vector<32x128xf32> to vector<2x128xf32>
    %cst_45 = arith.constant dense<0.000000e+00> : vector<2x128xf32>
    %135 = tpu.matmul %133, %74, %cst_45 {dimension_numbers = #tpu.dot_dimension_numbers<[1], [0], [0], [1], [0, 0, 1, 1], [], []>} : vector<2x32xf32>, vector<32x128xf32>, vector<2x128xf32> -> vector<2x128xf32>
    %136 = arith.addf %134, %135 : vector<2x128xf32>
    %137 = math.tanh %136 : vector<2x128xf32>
    %138 = arith.negf %136 : vector<2x128xf32>
    %139 = math.exp %138 : vector<2x128xf32>
    %cst_46 = arith.constant 1.000000e+00 : f32
    %140 = vector.broadcast %cst_46 : f32 to vector<2x128xf32>
    %141 = arith.addf %140, %139 : vector<2x128xf32>
    %142 = arith.divf %140, %141 : vector<2x128xf32>
    %143 = arith.select %21, %137, %142 : vector<2x128xi1>, vector<2x128xf32>
    %144 = vector.extract_strided_slice %143 {offsets = [0, 32], sizes = [2, 32], strides = [1, 1]} : vector<2x128xf32> to vector<2x32xf32>
    %145 = arith.mulf %144, %130 : vector<2x32xf32>
    %146 = vector.extract_strided_slice %143 {offsets = [0, 0], sizes = [2, 32], strides = [1, 1]} : vector<2x128xf32> to vector<2x32xf32>
    %147 = vector.extract_strided_slice %143 {offsets = [0, 64], sizes = [2, 32], strides = [1, 1]} : vector<2x128xf32> to vector<2x32xf32>
    %148 = arith.mulf %146, %147 : vector<2x32xf32>
    %149 = arith.addf %145, %148 : vector<2x32xf32>
    %150 = vector.extract_strided_slice %143 {offsets = [0, 96], sizes = [2, 32], strides = [1, 1]} : vector<2x128xf32> to vector<2x32xf32>
    %151 = math.tanh %149 : vector<2x32xf32>
    %152 = arith.mulf %150, %151 : vector<2x32xf32>
    %153 = vector.extract_strided_slice %73 {offsets = [8, 0], sizes = [2, 128], strides = [1, 1]} : vector<32x128xf32> to vector<2x128xf32>
    %cst_47 = arith.constant dense<0.000000e+00> : vector<2x128xf32>
    %154 = tpu.matmul %152, %74, %cst_47 {dimension_numbers = #tpu.dot_dimension_numbers<[1], [0], [0], [1], [0, 0, 1, 1], [], []>} : vector<2x32xf32>, vector<32x128xf32>, vector<2x128xf32> -> vector<2x128xf32>
    %155 = arith.addf %153, %154 : vector<2x128xf32>
    %156 = math.tanh %155 : vector<2x128xf32>
    %157 = arith.negf %155 : vector<2x128xf32>
    %158 = math.exp %157 : vector<2x128xf32>
    %cst_48 = arith.constant 1.000000e+00 : f32
    %159 = vector.broadcast %cst_48 : f32 to vector<2x128xf32>
    %160 = arith.addf %159, %158 : vector<2x128xf32>
    %161 = arith.divf %159, %160 : vector<2x128xf32>
    %162 = arith.select %21, %156, %161 : vector<2x128xi1>, vector<2x128xf32>
    %163 = vector.extract_strided_slice %162 {offsets = [0, 32], sizes = [2, 32], strides = [1, 1]} : vector<2x128xf32> to vector<2x32xf32>
    %164 = arith.mulf %163, %149 : vector<2x32xf32>
    %165 = vector.extract_strided_slice %162 {offsets = [0, 0], sizes = [2, 32], strides = [1, 1]} : vector<2x128xf32> to vector<2x32xf32>
    %166 = vector.extract_strided_slice %162 {offsets = [0, 64], sizes = [2, 32], strides = [1, 1]} : vector<2x128xf32> to vector<2x32xf32>
    %167 = arith.mulf %165, %166 : vector<2x32xf32>
    %168 = arith.addf %164, %167 : vector<2x32xf32>
    %169 = vector.extract_strided_slice %162 {offsets = [0, 96], sizes = [2, 32], strides = [1, 1]} : vector<2x128xf32> to vector<2x32xf32>
    %170 = math.tanh %168 : vector<2x32xf32>
    %171 = arith.mulf %169, %170 : vector<2x32xf32>
    %172 = vector.extract_strided_slice %73 {offsets = [10, 0], sizes = [2, 128], strides = [1, 1]} : vector<32x128xf32> to vector<2x128xf32>
    %cst_49 = arith.constant dense<0.000000e+00> : vector<2x128xf32>
    %173 = tpu.matmul %171, %74, %cst_49 {dimension_numbers = #tpu.dot_dimension_numbers<[1], [0], [0], [1], [0, 0, 1, 1], [], []>} : vector<2x32xf32>, vector<32x128xf32>, vector<2x128xf32> -> vector<2x128xf32>
    %174 = arith.addf %172, %173 : vector<2x128xf32>
    %175 = math.tanh %174 : vector<2x128xf32>
    %176 = arith.negf %174 : vector<2x128xf32>
    %177 = math.exp %176 : vector<2x128xf32>
    %cst_50 = arith.constant 1.000000e+00 : f32
    %178 = vector.broadcast %cst_50 : f32 to vector<2x128xf32>
    %179 = arith.addf %178, %177 : vector<2x128xf32>
    %180 = arith.divf %178, %179 : vector<2x128xf32>
    %181 = arith.select %21, %175, %180 : vector<2x128xi1>, vector<2x128xf32>
    %182 = vector.extract_strided_slice %181 {offsets = [0, 32], sizes = [2, 32], strides = [1, 1]} : vector<2x128xf32> to vector<2x32xf32>
    %183 = arith.mulf %182, %168 : vector<2x32xf32>
    %184 = vector.extract_strided_slice %181 {offsets = [0, 0], sizes = [2, 32], strides = [1, 1]} : vector<2x128xf32> to vector<2x32xf32>
    %185 = vector.extract_strided_slice %181 {offsets = [0, 64], sizes = [2, 32], strides = [1, 1]} : vector<2x128xf32> to vector<2x32xf32>
    %186 = arith.mulf %184, %185 : vector<2x32xf32>
    %187 = arith.addf %183, %186 : vector<2x32xf32>
    %188 = vector.extract_strided_slice %181 {offsets = [0, 96], sizes = [2, 32], strides = [1, 1]} : vector<2x128xf32> to vector<2x32xf32>
    %189 = math.tanh %187 : vector<2x32xf32>
    %190 = arith.mulf %188, %189 : vector<2x32xf32>
    %191 = vector.extract_strided_slice %73 {offsets = [12, 0], sizes = [2, 128], strides = [1, 1]} : vector<32x128xf32> to vector<2x128xf32>
    %cst_51 = arith.constant dense<0.000000e+00> : vector<2x128xf32>
    %192 = tpu.matmul %190, %74, %cst_51 {dimension_numbers = #tpu.dot_dimension_numbers<[1], [0], [0], [1], [0, 0, 1, 1], [], []>} : vector<2x32xf32>, vector<32x128xf32>, vector<2x128xf32> -> vector<2x128xf32>
    %193 = arith.addf %191, %192 : vector<2x128xf32>
    %194 = math.tanh %193 : vector<2x128xf32>
    %195 = arith.negf %193 : vector<2x128xf32>
    %196 = math.exp %195 : vector<2x128xf32>
    %cst_52 = arith.constant 1.000000e+00 : f32
    %197 = vector.broadcast %cst_52 : f32 to vector<2x128xf32>
    %198 = arith.addf %197, %196 : vector<2x128xf32>
    %199 = arith.divf %197, %198 : vector<2x128xf32>
    %200 = arith.select %21, %194, %199 : vector<2x128xi1>, vector<2x128xf32>
    %201 = vector.extract_strided_slice %200 {offsets = [0, 32], sizes = [2, 32], strides = [1, 1]} : vector<2x128xf32> to vector<2x32xf32>
    %202 = arith.mulf %201, %187 : vector<2x32xf32>
    %203 = vector.extract_strided_slice %200 {offsets = [0, 0], sizes = [2, 32], strides = [1, 1]} : vector<2x128xf32> to vector<2x32xf32>
    %204 = vector.extract_strided_slice %200 {offsets = [0, 64], sizes = [2, 32], strides = [1, 1]} : vector<2x128xf32> to vector<2x32xf32>
    %205 = arith.mulf %203, %204 : vector<2x32xf32>
    %206 = arith.addf %202, %205 : vector<2x32xf32>
    %207 = vector.extract_strided_slice %200 {offsets = [0, 96], sizes = [2, 32], strides = [1, 1]} : vector<2x128xf32> to vector<2x32xf32>
    %208 = math.tanh %206 : vector<2x32xf32>
    %209 = arith.mulf %207, %208 : vector<2x32xf32>
    %210 = vector.extract_strided_slice %73 {offsets = [14, 0], sizes = [2, 128], strides = [1, 1]} : vector<32x128xf32> to vector<2x128xf32>
    %cst_53 = arith.constant dense<0.000000e+00> : vector<2x128xf32>
    %211 = tpu.matmul %209, %74, %cst_53 {dimension_numbers = #tpu.dot_dimension_numbers<[1], [0], [0], [1], [0, 0, 1, 1], [], []>} : vector<2x32xf32>, vector<32x128xf32>, vector<2x128xf32> -> vector<2x128xf32>
    %212 = arith.addf %210, %211 : vector<2x128xf32>
    %213 = math.tanh %212 : vector<2x128xf32>
    %214 = arith.negf %212 : vector<2x128xf32>
    %215 = math.exp %214 : vector<2x128xf32>
    %cst_54 = arith.constant 1.000000e+00 : f32
    %216 = vector.broadcast %cst_54 : f32 to vector<2x128xf32>
    %217 = arith.addf %216, %215 : vector<2x128xf32>
    %218 = arith.divf %216, %217 : vector<2x128xf32>
    %219 = arith.select %21, %213, %218 : vector<2x128xi1>, vector<2x128xf32>
    %220 = vector.extract_strided_slice %219 {offsets = [0, 32], sizes = [2, 32], strides = [1, 1]} : vector<2x128xf32> to vector<2x32xf32>
    %221 = arith.mulf %220, %206 : vector<2x32xf32>
    %222 = vector.extract_strided_slice %219 {offsets = [0, 0], sizes = [2, 32], strides = [1, 1]} : vector<2x128xf32> to vector<2x32xf32>
    %223 = vector.extract_strided_slice %219 {offsets = [0, 64], sizes = [2, 32], strides = [1, 1]} : vector<2x128xf32> to vector<2x32xf32>
    %224 = arith.mulf %222, %223 : vector<2x32xf32>
    %225 = arith.addf %221, %224 : vector<2x32xf32>
    %226 = vector.extract_strided_slice %219 {offsets = [0, 96], sizes = [2, 32], strides = [1, 1]} : vector<2x128xf32> to vector<2x32xf32>
    %227 = math.tanh %225 : vector<2x32xf32>
    %228 = arith.mulf %226, %227 : vector<2x32xf32>
    %229 = vector.extract_strided_slice %73 {offsets = [16, 0], sizes = [2, 128], strides = [1, 1]} : vector<32x128xf32> to vector<2x128xf32>
    %cst_55 = arith.constant dense<0.000000e+00> : vector<2x128xf32>
    %230 = tpu.matmul %228, %74, %cst_55 {dimension_numbers = #tpu.dot_dimension_numbers<[1], [0], [0], [1], [0, 0, 1, 1], [], []>} : vector<2x32xf32>, vector<32x128xf32>, vector<2x128xf32> -> vector<2x128xf32>
    %231 = arith.addf %229, %230 : vector<2x128xf32>
    %232 = math.tanh %231 : vector<2x128xf32>
    %233 = arith.negf %231 : vector<2x128xf32>
    %234 = math.exp %233 : vector<2x128xf32>
    %cst_56 = arith.constant 1.000000e+00 : f32
    %235 = vector.broadcast %cst_56 : f32 to vector<2x128xf32>
    %236 = arith.addf %235, %234 : vector<2x128xf32>
    %237 = arith.divf %235, %236 : vector<2x128xf32>
    %238 = arith.select %21, %232, %237 : vector<2x128xi1>, vector<2x128xf32>
    %239 = vector.extract_strided_slice %238 {offsets = [0, 32], sizes = [2, 32], strides = [1, 1]} : vector<2x128xf32> to vector<2x32xf32>
    %240 = arith.mulf %239, %225 : vector<2x32xf32>
    %241 = vector.extract_strided_slice %238 {offsets = [0, 0], sizes = [2, 32], strides = [1, 1]} : vector<2x128xf32> to vector<2x32xf32>
    %242 = vector.extract_strided_slice %238 {offsets = [0, 64], sizes = [2, 32], strides = [1, 1]} : vector<2x128xf32> to vector<2x32xf32>
    %243 = arith.mulf %241, %242 : vector<2x32xf32>
    %244 = arith.addf %240, %243 : vector<2x32xf32>
    %245 = vector.extract_strided_slice %238 {offsets = [0, 96], sizes = [2, 32], strides = [1, 1]} : vector<2x128xf32> to vector<2x32xf32>
    %246 = math.tanh %244 : vector<2x32xf32>
    %247 = arith.mulf %245, %246 : vector<2x32xf32>
    %248 = vector.extract_strided_slice %73 {offsets = [18, 0], sizes = [2, 128], strides = [1, 1]} : vector<32x128xf32> to vector<2x128xf32>
    %cst_57 = arith.constant dense<0.000000e+00> : vector<2x128xf32>
    %249 = tpu.matmul %247, %74, %cst_57 {dimension_numbers = #tpu.dot_dimension_numbers<[1], [0], [0], [1], [0, 0, 1, 1], [], []>} : vector<2x32xf32>, vector<32x128xf32>, vector<2x128xf32> -> vector<2x128xf32>
    %250 = arith.addf %248, %249 : vector<2x128xf32>
    %251 = math.tanh %250 : vector<2x128xf32>
    %252 = arith.negf %250 : vector<2x128xf32>
    %253 = math.exp %252 : vector<2x128xf32>
    %cst_58 = arith.constant 1.000000e+00 : f32
    %254 = vector.broadcast %cst_58 : f32 to vector<2x128xf32>
    %255 = arith.addf %254, %253 : vector<2x128xf32>
    %256 = arith.divf %254, %255 : vector<2x128xf32>
    %257 = arith.select %21, %251, %256 : vector<2x128xi1>, vector<2x128xf32>
    %258 = vector.extract_strided_slice %257 {offsets = [0, 32], sizes = [2, 32], strides = [1, 1]} : vector<2x128xf32> to vector<2x32xf32>
    %259 = arith.mulf %258, %244 : vector<2x32xf32>
    %260 = vector.extract_strided_slice %257 {offsets = [0, 0], sizes = [2, 32], strides = [1, 1]} : vector<2x128xf32> to vector<2x32xf32>
    %261 = vector.extract_strided_slice %257 {offsets = [0, 64], sizes = [2, 32], strides = [1, 1]} : vector<2x128xf32> to vector<2x32xf32>
    %262 = arith.mulf %260, %261 : vector<2x32xf32>
    %263 = arith.addf %259, %262 : vector<2x32xf32>
    %264 = vector.extract_strided_slice %257 {offsets = [0, 96], sizes = [2, 32], strides = [1, 1]} : vector<2x128xf32> to vector<2x32xf32>
    %265 = math.tanh %263 : vector<2x32xf32>
    %266 = arith.mulf %264, %265 : vector<2x32xf32>
    %267 = vector.extract_strided_slice %73 {offsets = [20, 0], sizes = [2, 128], strides = [1, 1]} : vector<32x128xf32> to vector<2x128xf32>
    %cst_59 = arith.constant dense<0.000000e+00> : vector<2x128xf32>
    %268 = tpu.matmul %266, %74, %cst_59 {dimension_numbers = #tpu.dot_dimension_numbers<[1], [0], [0], [1], [0, 0, 1, 1], [], []>} : vector<2x32xf32>, vector<32x128xf32>, vector<2x128xf32> -> vector<2x128xf32>
    %269 = arith.addf %267, %268 : vector<2x128xf32>
    %270 = math.tanh %269 : vector<2x128xf32>
    %271 = arith.negf %269 : vector<2x128xf32>
    %272 = math.exp %271 : vector<2x128xf32>
    %cst_60 = arith.constant 1.000000e+00 : f32
    %273 = vector.broadcast %cst_60 : f32 to vector<2x128xf32>
    %274 = arith.addf %273, %272 : vector<2x128xf32>
    %275 = arith.divf %273, %274 : vector<2x128xf32>
    %276 = arith.select %21, %270, %275 : vector<2x128xi1>, vector<2x128xf32>
    %277 = vector.extract_strided_slice %276 {offsets = [0, 32], sizes = [2, 32], strides = [1, 1]} : vector<2x128xf32> to vector<2x32xf32>
    %278 = arith.mulf %277, %263 : vector<2x32xf32>
    %279 = vector.extract_strided_slice %276 {offsets = [0, 0], sizes = [2, 32], strides = [1, 1]} : vector<2x128xf32> to vector<2x32xf32>
    %280 = vector.extract_strided_slice %276 {offsets = [0, 64], sizes = [2, 32], strides = [1, 1]} : vector<2x128xf32> to vector<2x32xf32>
    %281 = arith.mulf %279, %280 : vector<2x32xf32>
    %282 = arith.addf %278, %281 : vector<2x32xf32>
    %283 = vector.extract_strided_slice %276 {offsets = [0, 96], sizes = [2, 32], strides = [1, 1]} : vector<2x128xf32> to vector<2x32xf32>
    %284 = math.tanh %282 : vector<2x32xf32>
    %285 = arith.mulf %283, %284 : vector<2x32xf32>
    %286 = vector.extract_strided_slice %73 {offsets = [22, 0], sizes = [2, 128], strides = [1, 1]} : vector<32x128xf32> to vector<2x128xf32>
    %cst_61 = arith.constant dense<0.000000e+00> : vector<2x128xf32>
    %287 = tpu.matmul %285, %74, %cst_61 {dimension_numbers = #tpu.dot_dimension_numbers<[1], [0], [0], [1], [0, 0, 1, 1], [], []>} : vector<2x32xf32>, vector<32x128xf32>, vector<2x128xf32> -> vector<2x128xf32>
    %288 = arith.addf %286, %287 : vector<2x128xf32>
    %289 = math.tanh %288 : vector<2x128xf32>
    %290 = arith.negf %288 : vector<2x128xf32>
    %291 = math.exp %290 : vector<2x128xf32>
    %cst_62 = arith.constant 1.000000e+00 : f32
    %292 = vector.broadcast %cst_62 : f32 to vector<2x128xf32>
    %293 = arith.addf %292, %291 : vector<2x128xf32>
    %294 = arith.divf %292, %293 : vector<2x128xf32>
    %295 = arith.select %21, %289, %294 : vector<2x128xi1>, vector<2x128xf32>
    %296 = vector.extract_strided_slice %295 {offsets = [0, 32], sizes = [2, 32], strides = [1, 1]} : vector<2x128xf32> to vector<2x32xf32>
    %297 = arith.mulf %296, %282 : vector<2x32xf32>
    %298 = vector.extract_strided_slice %295 {offsets = [0, 0], sizes = [2, 32], strides = [1, 1]} : vector<2x128xf32> to vector<2x32xf32>
    %299 = vector.extract_strided_slice %295 {offsets = [0, 64], sizes = [2, 32], strides = [1, 1]} : vector<2x128xf32> to vector<2x32xf32>
    %300 = arith.mulf %298, %299 : vector<2x32xf32>
    %301 = arith.addf %297, %300 : vector<2x32xf32>
    %302 = vector.extract_strided_slice %295 {offsets = [0, 96], sizes = [2, 32], strides = [1, 1]} : vector<2x128xf32> to vector<2x32xf32>
    %303 = math.tanh %301 : vector<2x32xf32>
    %304 = arith.mulf %302, %303 : vector<2x32xf32>
    %305 = vector.extract_strided_slice %73 {offsets = [24, 0], sizes = [2, 128], strides = [1, 1]} : vector<32x128xf32> to vector<2x128xf32>
    %cst_63 = arith.constant dense<0.000000e+00> : vector<2x128xf32>
    %306 = tpu.matmul %304, %74, %cst_63 {dimension_numbers = #tpu.dot_dimension_numbers<[1], [0], [0], [1], [0, 0, 1, 1], [], []>} : vector<2x32xf32>, vector<32x128xf32>, vector<2x128xf32> -> vector<2x128xf32>
    %307 = arith.addf %305, %306 : vector<2x128xf32>
    %308 = math.tanh %307 : vector<2x128xf32>
    %309 = arith.negf %307 : vector<2x128xf32>
    %310 = math.exp %309 : vector<2x128xf32>
    %cst_64 = arith.constant 1.000000e+00 : f32
    %311 = vector.broadcast %cst_64 : f32 to vector<2x128xf32>
    %312 = arith.addf %311, %310 : vector<2x128xf32>
    %313 = arith.divf %311, %312 : vector<2x128xf32>
    %314 = arith.select %21, %308, %313 : vector<2x128xi1>, vector<2x128xf32>
    %315 = vector.extract_strided_slice %314 {offsets = [0, 32], sizes = [2, 32], strides = [1, 1]} : vector<2x128xf32> to vector<2x32xf32>
    %316 = arith.mulf %315, %301 : vector<2x32xf32>
    %317 = vector.extract_strided_slice %314 {offsets = [0, 0], sizes = [2, 32], strides = [1, 1]} : vector<2x128xf32> to vector<2x32xf32>
    %318 = vector.extract_strided_slice %314 {offsets = [0, 64], sizes = [2, 32], strides = [1, 1]} : vector<2x128xf32> to vector<2x32xf32>
    %319 = arith.mulf %317, %318 : vector<2x32xf32>
    %320 = arith.addf %316, %319 : vector<2x32xf32>
    %321 = vector.extract_strided_slice %314 {offsets = [0, 96], sizes = [2, 32], strides = [1, 1]} : vector<2x128xf32> to vector<2x32xf32>
    %322 = math.tanh %320 : vector<2x32xf32>
    %323 = arith.mulf %321, %322 : vector<2x32xf32>
    %324 = vector.extract_strided_slice %73 {offsets = [26, 0], sizes = [2, 128], strides = [1, 1]} : vector<32x128xf32> to vector<2x128xf32>
    %cst_65 = arith.constant dense<0.000000e+00> : vector<2x128xf32>
    %325 = tpu.matmul %323, %74, %cst_65 {dimension_numbers = #tpu.dot_dimension_numbers<[1], [0], [0], [1], [0, 0, 1, 1], [], []>} : vector<2x32xf32>, vector<32x128xf32>, vector<2x128xf32> -> vector<2x128xf32>
    %326 = arith.addf %324, %325 : vector<2x128xf32>
    %327 = math.tanh %326 : vector<2x128xf32>
    %328 = arith.negf %326 : vector<2x128xf32>
    %329 = math.exp %328 : vector<2x128xf32>
    %cst_66 = arith.constant 1.000000e+00 : f32
    %330 = vector.broadcast %cst_66 : f32 to vector<2x128xf32>
    %331 = arith.addf %330, %329 : vector<2x128xf32>
    %332 = arith.divf %330, %331 : vector<2x128xf32>
    %333 = arith.select %21, %327, %332 : vector<2x128xi1>, vector<2x128xf32>
    %334 = vector.extract_strided_slice %333 {offsets = [0, 32], sizes = [2, 32], strides = [1, 1]} : vector<2x128xf32> to vector<2x32xf32>
    %335 = arith.mulf %334, %320 : vector<2x32xf32>
    %336 = vector.extract_strided_slice %333 {offsets = [0, 0], sizes = [2, 32], strides = [1, 1]} : vector<2x128xf32> to vector<2x32xf32>
    %337 = vector.extract_strided_slice %333 {offsets = [0, 64], sizes = [2, 32], strides = [1, 1]} : vector<2x128xf32> to vector<2x32xf32>
    %338 = arith.mulf %336, %337 : vector<2x32xf32>
    %339 = arith.addf %335, %338 : vector<2x32xf32>
    %340 = vector.extract_strided_slice %333 {offsets = [0, 96], sizes = [2, 32], strides = [1, 1]} : vector<2x128xf32> to vector<2x32xf32>
    %341 = math.tanh %339 : vector<2x32xf32>
    %342 = arith.mulf %340, %341 : vector<2x32xf32>
    %343 = vector.extract_strided_slice %73 {offsets = [28, 0], sizes = [2, 128], strides = [1, 1]} : vector<32x128xf32> to vector<2x128xf32>
    %cst_67 = arith.constant dense<0.000000e+00> : vector<2x128xf32>
    %344 = tpu.matmul %342, %74, %cst_67 {dimension_numbers = #tpu.dot_dimension_numbers<[1], [0], [0], [1], [0, 0, 1, 1], [], []>} : vector<2x32xf32>, vector<32x128xf32>, vector<2x128xf32> -> vector<2x128xf32>
    %345 = arith.addf %343, %344 : vector<2x128xf32>
    %346 = math.tanh %345 : vector<2x128xf32>
    %347 = arith.negf %345 : vector<2x128xf32>
    %348 = math.exp %347 : vector<2x128xf32>
    %cst_68 = arith.constant 1.000000e+00 : f32
    %349 = vector.broadcast %cst_68 : f32 to vector<2x128xf32>
    %350 = arith.addf %349, %348 : vector<2x128xf32>
    %351 = arith.divf %349, %350 : vector<2x128xf32>
    %352 = arith.select %21, %346, %351 : vector<2x128xi1>, vector<2x128xf32>
    %353 = vector.extract_strided_slice %352 {offsets = [0, 32], sizes = [2, 32], strides = [1, 1]} : vector<2x128xf32> to vector<2x32xf32>
    %354 = arith.mulf %353, %339 : vector<2x32xf32>
    %355 = vector.extract_strided_slice %352 {offsets = [0, 0], sizes = [2, 32], strides = [1, 1]} : vector<2x128xf32> to vector<2x32xf32>
    %356 = vector.extract_strided_slice %352 {offsets = [0, 64], sizes = [2, 32], strides = [1, 1]} : vector<2x128xf32> to vector<2x32xf32>
    %357 = arith.mulf %355, %356 : vector<2x32xf32>
    %358 = arith.addf %354, %357 : vector<2x32xf32>
    %359 = vector.extract_strided_slice %352 {offsets = [0, 96], sizes = [2, 32], strides = [1, 1]} : vector<2x128xf32> to vector<2x32xf32>
    %360 = math.tanh %358 : vector<2x32xf32>
    %361 = arith.mulf %359, %360 : vector<2x32xf32>
    %362 = vector.extract_strided_slice %73 {offsets = [30, 0], sizes = [2, 128], strides = [1, 1]} : vector<32x128xf32> to vector<2x128xf32>
    %cst_69 = arith.constant dense<0.000000e+00> : vector<2x128xf32>
    %363 = tpu.matmul %361, %74, %cst_69 {dimension_numbers = #tpu.dot_dimension_numbers<[1], [0], [0], [1], [0, 0, 1, 1], [], []>} : vector<2x32xf32>, vector<32x128xf32>, vector<2x128xf32> -> vector<2x128xf32>
    %364 = arith.addf %362, %363 : vector<2x128xf32>
    %365 = math.tanh %364 : vector<2x128xf32>
    %366 = arith.negf %364 : vector<2x128xf32>
    %367 = math.exp %366 : vector<2x128xf32>
    %cst_70 = arith.constant 1.000000e+00 : f32
    %368 = vector.broadcast %cst_70 : f32 to vector<2x128xf32>
    %369 = arith.addf %368, %367 : vector<2x128xf32>
    %370 = arith.divf %368, %369 : vector<2x128xf32>
    %371 = arith.select %21, %365, %370 : vector<2x128xi1>, vector<2x128xf32>
    %372 = vector.extract_strided_slice %371 {offsets = [0, 32], sizes = [2, 32], strides = [1, 1]} : vector<2x128xf32> to vector<2x32xf32>
    %373 = arith.mulf %372, %358 : vector<2x32xf32>
    %374 = vector.extract_strided_slice %371 {offsets = [0, 0], sizes = [2, 32], strides = [1, 1]} : vector<2x128xf32> to vector<2x32xf32>
    %375 = vector.extract_strided_slice %371 {offsets = [0, 64], sizes = [2, 32], strides = [1, 1]} : vector<2x128xf32> to vector<2x32xf32>
    %376 = arith.mulf %374, %375 : vector<2x32xf32>
    %377 = arith.addf %373, %376 : vector<2x32xf32>
    %378 = vector.extract_strided_slice %371 {offsets = [0, 96], sizes = [2, 32], strides = [1, 1]} : vector<2x128xf32> to vector<2x32xf32>
    %379 = math.tanh %377 : vector<2x32xf32>
    %380 = arith.mulf %378, %379 : vector<2x32xf32>
    %c0_71 = arith.constant 0 : index
    %c0_72 = arith.constant 0 : index
    %381 = vector.load %arg13[%c0_71, %c0_72] : memref<128x2xf32, #tpu.memory_space<vmem>>, vector<128x2xf32>
    %382 = vector.extract_strided_slice %381 {offsets = [0, 0], sizes = [64, 2], strides = [1, 1]} : vector<128x2xf32> to vector<64x2xf32>
    %cst_73 = arith.constant dense<0.000000e+00> : vector<2x2xf32>
    %383 = tpu.matmul %68, %382, %cst_73 {dimension_numbers = #tpu.dot_dimension_numbers<[1], [0], [0], [1], [0, 0, 1, 1], [], []>} : vector<2x64xf32>, vector<64x2xf32>, vector<2x2xf32> -> vector<2x2xf32>
    %384 = vector.extract_strided_slice %381 {offsets = [64, 0], sizes = [32, 2], strides = [1, 1]} : vector<128x2xf32> to vector<32x2xf32>
    %cst_74 = arith.constant dense<0.000000e+00> : vector<2x2xf32>
    %385 = tpu.matmul %380, %384, %cst_74 {dimension_numbers = #tpu.dot_dimension_numbers<[1], [0], [0], [1], [0, 0, 1, 1], [], []>} : vector<2x32xf32>, vector<32x2xf32>, vector<2x2xf32> -> vector<2x2xf32>
    %386 = arith.addf %383, %385 : vector<2x2xf32>
    %387 = vector.extract_strided_slice %381 {offsets = [96, 0], sizes = [32, 2], strides = [1, 1]} : vector<128x2xf32> to vector<32x2xf32>
    %cst_75 = arith.constant dense<0.000000e+00> : vector<2x2xf32>
    %388 = tpu.matmul %40, %387, %cst_75 {dimension_numbers = #tpu.dot_dimension_numbers<[1], [0], [0], [1], [0, 0, 1, 1], [], []>} : vector<2x32xf32>, vector<32x2xf32>, vector<2x2xf32> -> vector<2x2xf32>
    %389 = arith.addf %386, %388 : vector<2x2xf32>
    %c0_76 = arith.constant 0 : index
    %c0_77 = arith.constant 0 : index
    %390 = vector.load %arg14[%c0_76, %c0_77] : memref<1x2xf32, #tpu.memory_space<vmem>>, vector<1x2xf32>
    %391 = vector.broadcast %390 : vector<1x2xf32> to vector<2x2xf32>
    %392 = arith.addf %389, %391 : vector<2x2xf32>
    %c0_78 = arith.constant 0 : index
    %c0_79 = arith.constant 0 : index
    %393 = vector.load %arg15[%c0_78, %c0_79] : memref<2x2xf32, #tpu.memory_space<vmem>>, vector<2x2xf32>
    tpu.vector_store %arg15[%c0_78, %c0_79], %392 {strides = array<i32>} : memref<2x2xf32, #tpu.memory_space<vmem>>, vector<2x2xf32>,
    %cst_80 = arith.constant dense<0xFF800000> : vector<2xf32>
    %394 = vector.multi_reduction <maximumf>, %392, %cst_80 [1] : vector<2x2xf32> to vector<2xf32>
    %395 = vector.shape_cast %394 : vector<2xf32> to vector<2x1xf32>
    %396 = vector.broadcast %395 : vector<2x1xf32> to vector<2x2xf32>
    %397 = arith.subf %392, %396 : vector<2x2xf32>
    %398 = math.exp %397 : vector<2x2xf32>
    %cst_81 = arith.constant dense<0.000000e+00> : vector<2xf32>
    %399 = vector.multi_reduction <add>, %398, %cst_81 [1] : vector<2x2xf32> to vector<2xf32>
    %400 = vector.shape_cast %399 : vector<2xf32> to vector<2x1xf32>
    %401 = math.log %400 : vector<2x1xf32>
    %402 = vector.broadcast %401 : vector<2x1xf32> to vector<2x2xf32>
    %403 = arith.subf %397, %402 : vector<2x2xf32>
    %404 = tpu.iota {dimensions = array<i32: 1>} : vector<2x2xi32>
    %c0_82 = arith.constant 0 : index
    %c0_83 = arith.constant 0 : index
    %405 = vector.load %arg3[%c0_82, %c0_83] : memref<2x1xi32, #tpu.memory_space<vmem>>, vector<2x1xi32>
    %406 = vector.broadcast %405 : vector<2x1xi32> to vector<2x2xi32>
    %407 = arith.cmpi eq, %404, %406 : vector<2x2xi32>
    %408 = arith.extui %407 : vector<2x2xi1> to vector<2x2xi32>
    %409 = arith.sitofp %408 : vector<2x2xi32> to vector<2x2xf32>
    %410 = arith.mulf %403, %409 : vector<2x2xf32>
    %cst_84 = arith.constant dense<0.000000e+00> : vector<2xf32>
    %411 = vector.multi_reduction <add>, %410, %cst_84 [1] : vector<2x2xf32> to vector<2xf32>
    %412 = vector.shape_cast %411 : vector<2xf32> to vector<2x1xf32>
    %cst_85 = arith.constant 0.000000e+00 : f32
    %413 = vector.broadcast %cst_85 : f32 to vector<2x1xf32>
    %414 = arith.subf %413, %412 : vector<2x1xf32>
    %cst_86 = arith.constant dense<0.000000e+00> : vector<1xf32>
    %415 = vector.multi_reduction <add>, %414, %cst_86 [0] : vector<2x1xf32> to vector<1xf32>
    %416 = vector.shape_cast %415 : vector<1xf32> to vector<1x1xf32>
    %cst_87 = arith.constant 5.000000e-01 : f32
    %417 = vector.broadcast %cst_87 : f32 to vector<1x1xf32>
    %418 = arith.mulf %416, %417 : vector<1x1xf32>
    %c0_88 = arith.constant 0 : index
    %c0_89 = arith.constant 0 : index
    %419 = vector.load %arg16[%c0_88, %c0_89] : memref<1x1xf32, #tpu.memory_space<vmem>>, vector<1x1xf32>
    tpu.vector_store %arg16[%c0_88, %c0_89], %418 {strides = array<i32>} : memref<1x1xf32, #tpu.memory_space<vmem>>, vector<1x1xf32>,
    return
  }
  func.func @transform_0(%arg0: i32) -> (i32, i32) {
    %c0_i32 = arith.constant 0 : i32
    %c0_i32_0 = arith.constant 0 : i32
    %c0_i32_1 = arith.constant 0 : i32
    return %c0_i32, %c0_i32_0 : i32, i32
  }
  func.func @transform_1(%arg0: i32) -> (i32, i32) {
    %c0_i32 = arith.constant 0 : i32
    %c0_i32_0 = arith.constant 0 : i32
    %c0_i32_1 = arith.constant 0 : i32
    return %c0_i32, %c0_i32_0 : i32, i32
  }
  func.func @transform_2(%arg0: i32) -> (i32, i32) {
    %c0_i32 = arith.constant 0 : i32
    %c0_i32_0 = arith.constant 0 : i32
    %c0_i32_1 = arith.constant 0 : i32
    return %c0_i32, %c0_i32_0 : i32, i32
  }
  func.func @transform_3(%arg0: i32) -> (i32, i32) {
    %c0_i32 = arith.constant 0 : i32
    %c0_i32_0 = arith.constant 0 : i32
    %c0_i32_1 = arith.constant 0 : i32
    return %c0_i32, %c0_i32_0 : i32, i32
  }
  func.func @transform_4(%arg0: i32) -> (i32, i32) {
    %c0_i32 = arith.constant 0 : i32
    %c0_i32_0 = arith.constant 0 : i32
    %c0_i32_1 = arith.constant 0 : i32
    return %c0_i32, %c0_i32_0 : i32, i32
  }
  func.func @transform_5(%arg0: i32) -> (i32, i32) {
    %c0_i32 = arith.constant 0 : i32
    %c0_i32_0 = arith.constant 0 : i32
    %c0_i32_1 = arith.constant 0 : i32
    return %c0_i32, %c0_i32_0 : i32, i32
  }
  func.func @transform_6(%arg0: i32) -> (i32, i32) {
    %c0_i32 = arith.constant 0 : i32
    %c0_i32_0 = arith.constant 0 : i32
    %c0_i32_1 = arith.constant 0 : i32
    return %c0_i32, %c0_i32_0 : i32, i32
  }
  func.func @transform_7(%arg0: i32) -> (i32, i32) {
    %c0_i32 = arith.constant 0 : i32
    %c0_i32_0 = arith.constant 0 : i32
    %c0_i32_1 = arith.constant 0 : i32
    return %c0_i32, %c0_i32_0 : i32, i32
  }
  func.func @transform_8(%arg0: i32) -> (i32, i32) {
    %c0_i32 = arith.constant 0 : i32
    %c0_i32_0 = arith.constant 0 : i32
    %c0_i32_1 = arith.constant 0 : i32
    return %c0_i32, %c0_i32_0 : i32, i32
  }
  func.func @transform_9(%arg0: i32) -> (i32, i32) {
    %c0_i32 = arith.constant 0 : i32
    %c0_i32_0 = arith.constant 0 : i32
    %c0_i32_1 = arith.constant 0 : i32
    return %c0_i32, %c0_i32_0 : i32, i32
  }
  func.func @transform_10(%arg0: i32) -> (i32, i32, i32) {
    %c0_i32 = arith.constant 0 : i32
    %c0_i32_0 = arith.constant 0 : i32
    %c0_i32_1 = arith.constant 0 : i32
    %c0_i32_2 = arith.constant 0 : i32
    return %c0_i32, %c0_i32_0, %c0_i32_1 : i32, i32, i32
  }
  func.func @transform_11(%arg0: i32) -> (i32, i32) {
    %c0_i32 = arith.constant 0 : i32
    %c0_i32_0 = arith.constant 0 : i32
    %c0_i32_1 = arith.constant 0 : i32
    return %c0_i32, %c0_i32_0 : i32, i32
  }
  func.func @transform_12(%arg0: i32) -> (i32, i32) {
    %c0_i32 = arith.constant 0 : i32
    %c0_i32_0 = arith.constant 0 : i32
    %c0_i32_1 = arith.constant 0 : i32
    return %c0_i32, %c0_i32_0 : i32, i32
  }
  func.func @transform_13(%arg0: i32) -> (i32, i32) {
    %c0_i32 = arith.constant 0 : i32
    %c0_i32_0 = arith.constant 0 : i32
    %c0_i32_1 = arith.constant 0 : i32
    return %c0_i32, %c0_i32_0 : i32, i32
  }
  func.func @transform_14(%arg0: i32) -> (i32, i32) {
    %c0_i32 = arith.constant 0 : i32
    %c0_i32_0 = arith.constant 0 : i32
    %c0_i32_1 = arith.constant 0 : i32
    return %c0_i32, %c0_i32_0 : i32, i32
  }
  func.func @transform_15(%arg0: i32) -> (i32, i32) {
    %c0_i32 = arith.constant 0 : i32
    %c0_i32_0 = arith.constant 0 : i32
    %c0_i32_1 = arith.constant 0 : i32
    return %c0_i32, %c0_i32_0 : i32, i32
  }
}

</mosaic_0001>

<bundles_post_ra>
// kernel: birnn_c_forward.1
= control target key start
LH: loop header
LB: loop body
LE: loop exit
PB: predicated region body
PF: predicated region fallthrough
CT: control target
= control target key end

     0   :  { %21 = vsyncpa [#allocation3], 0  ;;  %v3871_v2 = vmov 0   ;;  %s4539_s0 = inlined_call_operand.vmem [shape: s32[32,1], index: 0, kind: input, shape index: {}]   ;;  %s4540_s1 = inlined_call_operand.vmem [shape: s32[32,1], index: 1, kind: input, shape index: {}]   ;;  %s4541_s2 = inlined_call_operand.vmem [shape: s32[2,1], index: 2, kind: input, shape index: {}]   ;;  %s4542_s3 = inlined_call_operand.vmem [shape: f32[50,32], index: 3, kind: input, shape index: {}]   ;;  %s4543_s4 = inlined_call_operand.vmem [shape: f32[50,32], index: 4, kind: input, shape index: {}]   ;;  %s4544_s5 = inlined_call_operand.vmem [shape: f32[32,128], index: 5, kind: input, shape index: {}]   ;;  %s4545_s6 = inlined_call_operand.vmem [shape: f32[32,128], index: 6, kind: input, shape index: {}]   ;;  %s4546_s7 = inlined_call_operand.vmem [shape: f32[1,128], index: 7, kind: input, shape index: {}]   ;;  %s4547_s8 = inlined_call_operand.vmem [shape: f32[32,128], index: 8, kind: input, shape index: {}]   ;;  %s4548_s9 = inlined_call_operand.vmem [shape: f32[1,128], index: 9, kind: input, shape index: {}]   ;;  %s4549_s10 = inlined_call_operand.vmem [shape: f32[3,32,64], index: 10, kind: input, shape index: {}]   ;;  %s4550_s11 = inlined_call_operand.vmem [shape: f32[1,64], index: 11, kind: input, shape index: {}]   ;;  %s4551_s12 = inlined_call_operand.vmem [shape: f32[128,2], index: 12, kind: input, shape index: {}]   ;;  %s4552_s13 = inlined_call_operand.vmem [shape: f32[1,2], index: 13, kind: input, shape index: {}]   ;;  %s4553_s14 = inlined_call_operand.hbm [shape: f32[2,2], index: 14, kind: output, shape index: {0}]   ;;  %s4554_s15 = inlined_call_operand.hbm [shape: f32[1,1], index: 15, kind: output, shape index: {1}]  }
   0x1   :  { %v55_v0 = vld [vmem:[%s4539_s0 + $0x10] sm:$0xff]  ;;  %v53_v1 = vld [vmem:[%s4539_s0] sm:$0xff]  ;;  %3682 = vset.pattern.permute.xlu1 %v3871_v2  ;;  %3681 = vset.pattern.permute.xlu0 %v3871_v2  ;;  %v56_v3 = vld [vmem:[%s4539_s0 + $0x18] sm:$0xff] }
   0x2   :  { %v109_v4 = vld [vmem:[%s4542_s3] sm:$0xff]  ;;  %v110_v5 = vld [vmem:[%s4542_s3 + $0x8] sm:$0xff]  ;;  %64 = vperm.xlu1 %3682, %v55_v0   ;;  %58 = vperm.xlu0 %3681, %v53_v1   ;;  %v111_v8 = vld [vmem:[%s4542_s3 + $0x10] sm:$0xff] }
   0x3   :  { %v54_v6 = vld [vmem:[%s4539_s0 + $0x8] sm:$0xff]  ;;  %v3482_v7 = vpack.c.bf16 %v110_v5, %v109_v4  ;;  %v112_v9 = vld [vmem:[%s4542_s3 + $0x18] sm:$0xff]  ;;  %v113_v11 = vld [vmem:[%s4542_s3 + $0x20] sm:$0xff] }
   0x4   :  { %v3486_v10 = vpack.c.bf16 %v112_v9, %v111_v8  ;;  %v114_v12 = vld [vmem:[%s4542_s3 + $0x28] sm:$0xff] }
   0x5   :  { %22 = vsyncpa [#allocation5], 0  ;;  %3483 = vmatprep.subr.bf16.mxu0 %v3482_v7  ;;  %v3490_v13 = vpack.c.bf16 %v114_v12, %v113_v11  ;;  %v115_v14 = vld [vmem:[%s4542_s3 + $0x30] sm:$0x3]  ;;  %vm129_vm0 = vcmask 1041408   ;;  %v3872_v15 = vmov 0.0|0.0   ;;  %v51_v16 = vlaneseq }
   0x6   :  { %3485 = vmatpush3.bf16.msra.mxu0 %v3482_v7  ;;  %67 = vperm.xlu1 %3682, %v56_v3   ;;  %vm116_vm1 = vcmask 408576   ;;  %v328_v20 = vld [vmem:[%s4547_s8] sm:$0xff]  ;;  %v329_v21 = vld [vmem:[%s4547_s8 + $0x8] sm:$0xff]  ;;  %v3873_v22 = vmov 0.0   ;;  %v330_v30 = vld [vmem:[%s4547_s8 + $0x10] sm:$0xff]  ;;  %vm3874_vm6 = vmmov 0  }
   0x7   :  { %61 = vperm.xlu0 %3681, %v54_v6   ;;  %3487 = vmatprep.subr.bf16.mxu0 %v3486_v10  ;;  %v3996_v17 = vand.u32 127, %v51_v16  ;;  %v3507_v26 = vpack.c.bf16 %v329_v21, %v328_v20  ;;  %v331_v31 = vld [vmem:[%s4547_s8 + $0x18] sm:$0xff]  ;;  %v787_v33 = vld [vmem:[%s4544_s5] sm:$0xff]  ;;  %v788_v34 = vld [vmem:[%s4544_s5 + $0x8] sm:$0xff]  ;;  %vm341_vm7 = vcmask 261120   ;;  %s3876_s29 = smov 32  }
   0x8   :  { %v3510_v32 = vpack.c.bf16 %v331_v31, %v330_v30  ;;  %v3536_v35 = vpack.c.bf16 %v788_v34, %v787_v33  ;;  %v789_v38 = vld [vmem:[%s4544_s5 + $0x10] sm:$0xff]  ;;  %v790_v39 = vld [vmem:[%s4544_s5 + $0x18] sm:$0xff]  ;;  %v894_v44 = vld [vmem:[%s4545_s6] sm:$0xff]  ;;  %vm446_vm15 = vcmask 1046528  }
   0x9   :  { %v3540_v43 = vpack.c.bf16 %v790_v39, %v789_v38  ;;  %v895_v45 = vld [vmem:[%s4545_s6 + $0x8] sm:$0xff]  ;;  %v896_v47 = vld [vmem:[%s4545_s6 + $0x10] sm:$0xff]  ;;  %v897_v48 = vld [vmem:[%s4545_s6 + $0x18] sm:$0xff]  ;;  %vm325_vm8 = vcmp.ge.s32.totalorder %v3996_v17, 64  ;;  %vm326_vm9 = vcmp.lt.s32.totalorder %v3996_v17, 96 }
   0xa   :  { %3489 = vmatpush3.bf16.msra.mxu0 %v3486_v10  ;;  %v4045_v46 = vpack.c.bf16 %v895_v45, %v894_v44  ;;  %v4057_v49 = vpack.c.bf16 %v897_v48, %v896_v47  ;;  %v2959_v52 = vld [vmem:[%s4546_s7] ss:$0 sm:$0xff]  ;;  %vm4088_vm10 = vmand %vm325_vm8, %vm326_vm9  ;;  %s3875_s7 = smov 64   ;;  %v221_v21 = vld [vmem:[%s4543_s4 + $0x18] sm:$0xff] }
   0xb   :  { %3491 = vmatprep.subr.bf16.mxu0 %v3490_v13  ;;  %v218_v16 = vld [vmem:[%s4543_s4] sm:$0xff]  ;;  %v224_v30 = vld [vmem:[%s4543_s4 + $0x30] sm:$0x3]  ;;  %v84_v31 = vld [vmem:[%s4540_s1 + $0x18] sm:$0xff] }
   0xc   :  { %v2940_v44 = vld [vmem:[%s4549_s10 + $0x30] sm:$0xff]  ;;  %v2941_v45 = vld [vmem:[%s4549_s10 + $0x38] sm:$0xff]  ;;  %v433_v48 = vld [vmem:[%s4549_s10] sm:$0xff] }
   0xd   :  { %v3516_v47 = vpack.c.bf16 %v2941_v45, %v2940_v44  ;;  %v2612_v5 = vld [vmem:[%s4551_s12 + $0x40] sm:$0xff] }
   0xe   :  { %3493 = vmatpush3.bf16.msra.mxu0 %v3490_v13  ;;  %v81_v13 = vld [vmem:[%s4540_s1] sm:$0xff] }
   0xf   :  { %3170 = vmatprep.subr.msk.mxu0 %vm129_vm0, %v115_v14 }
  0x12   :  { %3171 = vmatpush3.msk.msra.mxu0 %vm129_vm0, %v115_v14  ;;  %v83_v14 = vld [vmem:[%s4540_s1 + $0x10] sm:$0xff] }
  0x13   :  { %3506 = vmatprep.subr.bf16.mxu0 %v3872_v15 }
  0x81   :  { %v65_v18 = vpop.permute.xlu1 %64  ;;  %v59_v19 = vpop.permute.xlu0 %58 }
  0x82   :  { %vm69_vm2 = vcmp.eq.s32.totalorder %v3996_v17, %v59_v19  ;;  %vm71_vm3 = vcmp.eq.s32.totalorder %v3996_v17, %v65_v18  ;;  %v219_v18 = vld [vmem:[%s4543_s4 + $0x8] sm:$0xff]  ;;  %v220_v19 = vld [vmem:[%s4543_s4 + $0x10] sm:$0xff] }
  0x83   :  { %v2917_v23 = vsel %vm69_vm2, 1.0, %v3873_v22  ;;  %v2919_v27 = vsel %vm71_vm3, 1.0, %v3873_v22  ;;  %v3494_v20 = vpack.c.bf16 %v219_v18, %v218_v16  ;;  %vm767_vm2 = vcmask 521216  }
  0x84   :  { %3172 = vmatprep.mubr.msk.f32.mxu0 %vm116_vm1, %v2917_v23  ;;  %v3498_v23 = vpack.c.bf16 %v221_v21, %v220_v19  ;;  %vm765_vm3 = vcmask 523264  }
  0x85   :  { %v68_v24 = vpop.permute.xlu1 %67  ;;  %3495 = vmatprep.subr.bf16.mxu1 %v3494_v20 }
  0x86   :  { %v62_v25 = vpop.permute.xlu0 %61  ;;  %vm72_vm5 = vcmp.eq.s32.totalorder %v3996_v17, %v68_v24  ;;  %v222_v24 = vld [vmem:[%s4543_s4 + $0x20] sm:$0xff]  ;;  %3497 = vmatpush3.bf16.msra.mxu1 %v3494_v20 }
  0x87   :  { %vm70_vm4 = vcmp.eq.s32.totalorder %v3996_v17, %v62_v25  ;;  %v2920_v29 = vsel %vm72_vm5, 1.0, %v3873_v22  ;;  %v223_v25 = vld [vmem:[%s4543_s4 + $0x28] sm:$0xff]  ;;  %3499 = vmatprep.subr.bf16.mxu1 %v3498_v23  ;;  %vm2853_vm5 = vcmask 9216  }
  0x88   :  { %v2918_v28 = vsel %vm70_vm4, 1.0, %v3873_v22  ;;  %vm785_vm4 = vcmask 1040384  }
  0x89   :  { %3173 = vmatmul.mubr.msk.f32.vlgmr.msra.gmra.mrb[0].mxu0 %vm116_vm1, %v2918_v28 }
  0x8a   :  { %3175 = vmatprep.mubr.msk.f32.mxu0 %vm116_vm1, %v2919_v27  ;;  %3508 = vmatpush3.bf16.msra.mxu0 %v3507_v26  ;;  %v3502_v26 = vpack.c.bf16 %v223_v25, %v222_v24  ;;  %v2950_v24 = vld [vmem:[%s4549_s10 + $0x40] sm:$0xff]  ;;  %v2951_v25 = vld [vmem:[%s4549_s10 + $0x48] sm:$0xff] }
  0x8b   :  { %3509 = vmatprep.subr.bf16.mxu0 %v3872_v15  ;;  %3501 = vmatpush3.bf16.msra.mxu1 %v3498_v23 }
  0x8c   :  { %3503 = vmatprep.subr.bf16.mxu1 %v3502_v26 }
  0x8d   :  { %3176 = vmatmul.mubr.msk.f32.gmra.mrb[2].mxu0 %vm116_vm1, %v2920_v29  ;;  %v82_v29 = vld [vmem:[%s4540_s1 + $0x8] sm:$0xff] }
  0x8e   :  { %3511 = vmatpush3.bf16.msra.mxu0 %v3510_v32  ;;  %3206 = vmatprep.mubr.msk.f32.mxu0 %vm3874_vm6, %v3873_v22 }
  0x8f   :  { %3537 = vmatprep.subr.bf16.mxu0 %v3536_v35  ;;  %3505 = vmatpush3.bf16.msra.mxu1 %v3502_v26 }
  0x90   :  { %3190 = vmatprep.subr.msk.mxu1 %vm129_vm0, %v224_v30 }
  0x93   :  { %3191 = vmatpush3.msk.msra.mxu1 %vm129_vm0, %v224_v30  ;;  %v3528_v30 = vpack.c.bf16 %v2951_v25, %v2950_v24 }
 0x15c   :  { %v3174_v36 = vpop.f32.mrb[0].mxu0 }
 0x15d   :  { %v199_v37 = vpop.f32.mrb[1].mxu0 }
 0x160   :  { %v3177_v40 = vpop.f32.mrb[2].mxu0 }
 0x161   :  { %v340_v41 = vrot.slane %v3177_v40, 6  ;;  %v209_v42 = vpop.f32.mrb[3].mxu0 }
 0x163   :  { %3207 = vmatmul.mubr.msk.f32.vlgmr.msra.gmra.mrb[4].mxu0 %vm341_vm7, %v340_v41  ;;  %v2938_v41 = vld [vmem:[%s4549_s10 + $0x20] sm:$0xff] }
 0x164   :  { %3539 = vmatpush3.bf16.msra.mxu0 %v3536_v35  ;;  %3259 = vmatprep.mubr.msk.f32.mxu0 %vm341_vm7, %v199_v37 }
 0x165   :  { %3541 = vmatprep.subr.bf16.mxu0 %v3540_v43 }
 0x168   :  { %3543 = vmatpush3.bf16.msra.mxu0 %v3540_v43 }
 0x169   :  { %3544 = vmatprep.subr.bf16.mxu0 %v3872_v15 }
 0x16b   :  { %3260 = vmatmul.mubr.msk.f32.vlgmr.msra.gmra.mrb[6].mxu0 %vm341_vm7, %v3174_v36 }
 0x16c   :  { %3262 = vmatprep.mubr.msk.f32.mxu0 %vm341_vm7, %v209_v42  ;;  %3546 = vmatpush3.bf16.msra.mxu0 %v4045_v46  ;;  %v2939_v42 = vld [vmem:[%s4549_s10 + $0x28] sm:$0xff] }
 0x16d   :  { %3547 = vmatprep.subr.bf16.mxu0 %v3872_v15  ;;  %v3512_v43 = vpack.c.bf16 %v2939_v42, %v2938_v41 }
 0x16f   :  { %3263 = vmatmul.mubr.msk.f32.gmra.mrb[8].mxu0 %vm341_vm7, %v3177_v40  ;;  %3513 = vmatprep.subr.bf16.mxu1 %v3512_v43 }
 0x170   :  { %3549 = vmatpush3.bf16.msra.mxu0 %v4057_v49  ;;  %3273 = vmatprep.mubr.msk.f32.mxu0 %vm3874_vm6, %v3873_v22 }
 0x171   :  { %3550 = vmatprep.subr.bf16.mxu0 %v3872_v15 }
 0x173   :  { %3274 = vmatmul.mubr.f32.vlgmr.msra.gmra.mrb[10].mxu0 %v3873_v22 }
 0x174   :  { %3552 = vmatpush3.bf16.msra.mxu0 %v4045_v46  ;;  %3284 = vmatprep.mubr.msk.f32.mxu0 %vm3874_vm6, %v3873_v22 }
 0x175   :  { %3553 = vmatprep.subr.bf16.mxu0 %v3872_v15 }
 0x178   :  { %3555 = vmatpush3.bf16.msra.mxu0 %v4057_v49 }
 0x179   :  { %3562 = vmatprep.subr.bf16.mxu0 %v3872_v15 }
 0x236   :  { %v4072_v50 = vpop.f32.mrb[4].mxu0 }
 0x237   :  { %v3208_v51 = vpop.f32.mrb[5].mxu0 }
 0x238   :  { %v434_v51 = vld [vmem:[%s4549_s10 + $0x8] sm:$0xff] }
 0x23e   :  { %v3261_v53 = vpop.f32.mrb[6].mxu0 }
 0x23f   :  { %v4077_v54 = vadd.f32 %v3261_v53, %v2959_v52  ;;  %v875_v55 = vpop.f32.mrb[7].mxu0 }
 0x240   :  { %v4083_v60 = vadd.f32 %v2959_v52, %v875_v55 }
 0x242   :  { %v3264_v56 = vpop.f32.mrb[8].mxu0 }
 0x243   :  { %v4079_v57 = vadd.f32 %v3264_v56, %v2959_v52  ;;  %v885_v58 = vpop.f32.mrb[9].mxu0 }
 0x244   :  { %v4081_v59 = vadd.f32 %v2959_v52, %v885_v58  ;;  %v3520_v52 = vpack.c.bf16 %v434_v51, %v433_v48 }
 0x246   :  { %v967_v61 = vpop.f32.mrb[10].mxu0 }
 0x247   :  { %v971_v62 = vadd.f32 %v967_v61, %v4083_v60  ;;  %v3275_v63 = vpop.f32.mrb[11].mxu0 }
 0x249   :  { %v2964_v0 = vmul.f32 -1.442695, %v971_v62 }
 0x24b   :  { %3683 = vpow2.f32 %v2964_v0 }
 0x24c   :  { %3685 = vtanh.f32 %v971_v62 }
 0x255   :  { %v3684_v1 = vpop.eup %3683 }
 0x256   :  { %v976_v2 = vadd.f32 1.0, %v3684_v1  ;;  %v3686_v3 = vpop.eup %3685 }
 0x258   :  { %3687 = vrcp.f32 %v976_v2 }
 0x262   :  { %v3688_v4 = vpop.eup %3687 }
 0x263   :  { %v979_v6 = vsel %vm4088_vm10, %v3686_v3, %v3688_v4 }
 0x264   :  { %982 = vrot.lane.b32.xlu0 %v979_v6, %s3875_s7  ;;  %v980_v9 = vmul.f32 0.0, %v979_v6 }
 0x2d6   :  { %v983_v7 = vpop.permute.xlu0 %982 }
 0x2d7   :  { %v985_v8 = vmul.f32 %v983_v7, %v979_v6 }
 0x2d9   :  { %987 = vrot.lane.b32.xlu1 %v985_v8, %s3876_s29 }
 0x34b   :  { %v988_v10 = vpop.permute.xlu1 %987 }
 0x34c   :  { %v4096_v11 = vadd.f32 %v988_v10, %v980_v9  ;;  %v435_v9 = vld [vmem:[%s4549_s10 + $0x10] sm:$0xff]  ;;  %v436_v10 = vld [vmem:[%s4549_s10 + $0x18] sm:$0xff] }
 0x34d   :  { %v3524_v20 = vpack.c.bf16 %v436_v10, %v435_v9 }
 0x34e   :  { %3689 = vtanh.f32 %v4096_v11  ;;  %v1085_v45 = vrot.slane %v4096_v11, 6 }
 0x358   :  { %v3690_v12 = vpop.eup %3689 }
 0x359   :  { %993 = vrot.lane.b32.xlu0 %v3690_v12, %s3875_s7 }
 0x35d   :  { %86 = vperm.xlu0 %3681, %v81_v13  }
 0x361   :  { %92 = vperm.xlu0 %3681, %v83_v14  }
 0x3cb   :  { %v994_v27 = vpop.permute.xlu0 %993 }
 0x3cc   :  { %v996_v28 = vmul.f32 %v994_v27, %v979_v6 }
 0x3ce   :  { %998 = vrot.lane.b32.xlu1 %v996_v28, %s3876_s29 }
 0x3d2   :  { %89 = vperm.xlu1 %3682, %v82_v29  }
 0x3d6   :  { %95 = vperm.xlu1 %3682, %v84_v31  }
 0x3dc   :  { %v87_v32 = vpop.permute.xlu0 %86 }
 0x3dd   :  { %vm97_vm11 = vcmp.eq.s32.totalorder %v3996_v17, %v87_v32  ;;  %v2952_v32 = vld [vmem:[%s4549_s10 + $0x50] sm:$0xff] }
 0x3de   :  { %v2921_v33 = vsel %vm97_vm11, 1.0, %v3873_v22 }
 0x3df   :  { %3192 = vmatprep.mubr.msk.f32.mxu1 %vm116_vm1, %v2921_v33  ;;  %v2953_v33 = vld [vmem:[%s4549_s10 + $0x58] sm:$0xff] }
 0x3e0   :  { %v93_v35 = vpop.permute.xlu0 %92 }
 0x3e1   :  { %vm99_vm12 = vcmp.eq.s32.totalorder %v3996_v17, %v93_v35 }
 0x3e2   :  { %v2923_v38 = vsel %vm99_vm12, 1.0, %v3873_v22 }
 0x440   :  { %v999_v34 = vpop.permute.xlu1 %998 }
 0x441   :  { %3285 = vmatmul.mubr.msk.f32.vlgmr.msra.gmra.mrb[12].mxu0 %vm341_vm7, %v999_v34  ;;  %v3532_v34 = vpack.c.bf16 %v2953_v33, %v2952_v32 }
 0x442   :  { %3564 = vmatpush3.bf16.msra.mxu0 %v4045_v46  ;;  %3306 = vmatprep.mubr.msk.f32.mxu0 %vm3874_vm6, %v3873_v22 }
 0x443   :  { %3565 = vmatprep.subr.bf16.mxu0 %v3872_v15 }
 0x446   :  { %3567 = vmatpush3.bf16.msra.mxu0 %v4057_v49 }
 0x447   :  { %3574 = vmatprep.subr.bf16.mxu0 %v3872_v15 }
 0x451   :  { %v90_v36 = vpop.permute.xlu1 %89 }
 0x452   :  { %vm98_vm13 = vcmp.eq.s32.totalorder %v3996_v17, %v90_v36 }
 0x453   :  { %v2922_v37 = vsel %vm98_vm13, 1.0, %v3873_v22 }
 0x454   :  { %3193 = vmatmul.mubr.msk.f32.vlgmr.msra.gmra.mrb[0].mxu1 %vm116_vm1, %v2922_v37  ;;  %v2958_v37 = vld [vmem:[%s4550_s11] ss:$0 sm:$0xff] }
 0x455   :  { %v96_v39 = vpop.permute.xlu1 %95  ;;  %3195 = vmatprep.mubr.msk.f32.mxu1 %vm116_vm1, %v2923_v38  ;;  %3515 = vmatpush3.bf16.msra.mxu1 %v3512_v43 }
 0x456   :  { %vm100_vm14 = vcmp.eq.s32.totalorder %v3996_v17, %v96_v39  ;;  %3517 = vmatprep.subr.bf16.mxu1 %v3516_v47 }
 0x457   :  { %v2924_v40 = vsel %vm100_vm14, 1.0, %v3873_v22 }
 0x458   :  { %3196 = vmatmul.mubr.msk.f32.gmra.mrb[2].mxu1 %vm116_vm1, %v2924_v40  ;;  %vm645_vm1 = vcmask 1045504  }
 0x459   :  { %3519 = vmatpush3.bf16.msra.mxu1 %v3516_v47 }
 0x45a   :  { %3521 = vmatprep.subr.bf16.mxu1 %v3520_v52 }
 0x514   :  { %v1068_v53 = vpop.f32.mrb[12].mxu0 }
 0x515   :  { %v1073_v55 = vrot.slane %v1068_v53, 6  ;;  %v3286_v56 = vpop.f32.mrb[13].mxu0 }
 0x517   :  { %v1075_v58 = vadd.f32 %v1073_v55, %v4083_v60 }
 0x519   :  { %v2966_v61 = vmul.f32 -1.442695, %v1075_v58 }
 0x51b   :  { %3691 = vpow2.f32 %v2966_v61 }
 0x51c   :  { %3693 = vtanh.f32 %v1075_v58 }
 0x525   :  { %v3692_v62 = vpop.eup %3691 }
 0x526   :  { %v1080_v63 = vadd.f32 1.0, %v3692_v62  ;;  %v3694_v28 = vpop.eup %3693 }
 0x527   :  { %v3194_v0 = vpop.f32.mrb[0].mxu1 }
 0x528   :  { %3695 = vrcp.f32 %v1080_v63  ;;  %v448_v1 = vrot.slane %v3194_v0, 1  ;;  %v647_v2 = vrot.slane %v3194_v0, 2  ;;  %v306_v3 = vpop.f32.mrb[1].mxu1 }
 0x529   :  { %v447_v4 = vrot.slane %v306_v3, 1  ;;  %v646_v6 = vrot.slane %v306_v3, 2 }
 0x52b   :  { %v3197_v7 = vpop.f32.mrb[2].mxu1  ;;  %v449_v8 = vsel %vm446_vm15, %v447_v4, %v448_v1  ;;  %v648_v12 = vsel %vm645_vm1, %v646_v6, %v647_v2 }
 0x52c   :  { %v452_v13 = vrot.slane %v3197_v7, 1  ;;  %v651_v14 = vrot.slane %v3197_v7, 2  ;;  %v316_v16 = vpop.f32.mrb[3].mxu1  ;;  %3217 = vmatprep.mubr.msk.f32.mxu1 %vm341_vm7, %v449_v8 }
 0x52d   :  { %v450_v18 = vrot.slane %v316_v16, 1  ;;  %v649_v19 = vrot.slane %v316_v16, 2 }
 0x52f   :  { %v451_v21 = vsel %vm446_vm15, %v448_v1, %v450_v18  ;;  %v453_v23 = vsel %vm446_vm15, %v450_v18, %v452_v13  ;;  %v650_v26 = vsel %vm645_vm1, %v647_v2, %v649_v19  ;;  %v652_v27 = vsel %vm645_vm1, %v649_v19, %v651_v14 }
 0x530   :  { %3218 = vmatmul.mubr.msk.f32.vlgmr.msra.gmra.mrb[4].mxu1 %vm341_vm7, %v451_v21 }
 0x531   :  { %3220 = vmatprep.mubr.msk.f32.mxu1 %vm341_vm7, %v453_v23  ;;  %3523 = vmatpush3.bf16.msra.mxu1 %v3520_v52 }
 0x532   :  { %v3696_v29 = vpop.eup %3695  ;;  %3525 = vmatprep.subr.bf16.mxu1 %v3524_v20 }
 0x533   :  { %v4197_v31 = vsel %vm4088_vm10, %v3694_v28, %v3696_v29 }
 0x534   :  { %1089 = vrot.lane.b32.xlu0 %v4197_v31, %s3875_s7  ;;  %3221 = vmatmul.mubr.msk.f32.gmra.mrb[6].mxu1 %vm341_vm7, %v452_v13  ;;  %v1087_v58 = vmul.f32 %v1085_v45, %v4197_v31 }
 0x535   :  { %3527 = vmatpush3.bf16.msra.mxu1 %v3524_v20  ;;  %3231 = vmatprep.mubr.msk.f32.mxu1 %vm341_vm7, %v306_v3 }
 0x536   :  { %3529 = vmatprep.subr.bf16.mxu1 %v3528_v30 }
 0x538   :  { %3232 = vmatmul.mubr.msk.f32.vlgmr.msra.gmra.mrb[4].mxu1 %vm341_vm7, %v3194_v0 }
 0x539   :  { %3234 = vmatprep.mubr.msk.f32.mxu1 %vm341_vm7, %v316_v16  ;;  %3531 = vmatpush3.bf16.msra.mxu1 %v3528_v30 }
 0x53a   :  { %3533 = vmatprep.subr.bf16.mxu1 %v3532_v34 }
 0x53c   :  { %3235 = vmatmul.mubr.msk.f32.gmra.mrb[6].mxu1 %vm341_vm7, %v3197_v7 }
 0x53d   :  { %3535 = vmatpush3.bf16.msra.mxu1 %v3532_v34  ;;  %3245 = vmatprep.mubr.msk.f32.mxu1 %vm341_vm7, %v648_v12 }
 0x53e   :  { %3556 = vmatprep.subr.bf16.mxu1 %v3872_v15 }
 0x540   :  { %3246 = vmatmul.mubr.msk.f32.vlgmr.msra.gmra.mrb[4].mxu1 %vm341_vm7, %v650_v26 }
 0x541   :  { %3248 = vmatprep.mubr.msk.f32.mxu1 %vm341_vm7, %v652_v27  ;;  %3558 = vmatpush3.bf16.msra.mxu1 %v4045_v46 }
 0x542   :  { %3559 = vmatprep.subr.bf16.mxu1 %v3872_v15 }
 0x544   :  { %3249 = vmatmul.mubr.msk.f32.gmra.mrb[6].mxu1 %vm341_vm7, %v651_v14 }
 0x545   :  { %3561 = vmatpush3.bf16.msra.mxu1 %v4057_v49  ;;  %3295 = vmatprep.mubr.msk.f32.mxu1 %vm3874_vm6, %v3873_v22 }
 0x546   :  { %3568 = vmatprep.subr.bf16.mxu1 %v3872_v15 }
 0x5a6   :  { %v1090_v35 = vpop.permute.xlu0 %1089 }
 0x5a7   :  { %v1092_v36 = vmul.f32 %v1090_v35, %v4197_v31 }
 0x5a9   :  { %1094 = vrot.lane.b32.xlu1 %v1092_v36, %s3876_s29 }
 0x613   :  { %v3247_v38 = vpop.f32.mrb[4].mxu1 }
 0x614   :  { %v758_v39 = vadd.f32 %v3247_v38, %v2958_v37  ;;  %v727_v40 = vpop.f32.mrb[5].mxu1 }
 0x615   :  { %v757_v41 = vadd.f32 %v2958_v37, %v727_v40 }
 0x616   :  { %v762_v42 = vmax.f32 %v758_v39, 0.0 }
 0x617   :  { %v761_v43 = vmax.f32 %v757_v41, 0.0  ;;  %v3250_v44 = vpop.f32.mrb[6].mxu1 }
 0x618   :  { %v768_v47 = vsel %vm767_vm2, %v762_v42, -inf  ;;  %v760_v48 = vadd.f32 %v3250_v44, %v2958_v37  ;;  %v737_v51 = vpop.f32.mrb[7].mxu1 }
 0x619   :  { %v766_v52 = vsel %vm765_vm3, %v761_v43, -inf  ;;  %v759_v53 = vadd.f32 %v2958_v37, %v737_v51 }
 0x61a   :  { %v769_v55 = vmax.f32 %v766_v52, %v768_v47  ;;  %v764_v56 = vmax.f32 %v760_v48, 0.0 }
 0x61b   :  { %v763_v61 = vmax.f32 %v759_v53, 0.0  ;;  %v1095_v62 = vpop.permute.xlu1 %1094 }
 0x61c   :  { %v770_v63 = vrot.slane %v769_v55, 4  ;;  %v777_v0 = vsel %vm767_vm2, %v764_v56, -inf  ;;  %v1097_v1 = vadd.f32 %v1095_v62, %v1087_v58 }
 0x61d   :  { %v776_v2 = vsel %vm765_vm3, %v763_v61, -inf }
 0x61e   :  { %v771_v11 = vmax.f32 %v769_v55, %v770_v63  ;;  %v778_v3 = vmax.f32 %v776_v2, %v777_v0  ;;  %3697 = vtanh.f32 %v1097_v1  ;;  %v1193_v37 = vrot.slane %v1097_v1, 6 }
 0x620   :  { %v772_v4 = vrot.slane %v771_v11, 2  ;;  %v779_v6 = vrot.slane %v778_v3, 4 }
 0x622   :  { %v773_v7 = vmax.f32 %v771_v11, %v772_v4  ;;  %v780_v8 = vmax.f32 %v778_v3, %v779_v6 }
 0x624   :  { %v781_v9 = vrot.slane %v780_v8, 2  ;;  %v774_v10 = vrot.slane %v773_v7, 1 }
 0x626   :  { %v782_v12 = vmax.f32 %v780_v8, %v781_v9  ;;  %v775_v16 = vmax.f32 %v773_v7, %v774_v10 }
 0x628   :  { %v3698_v13 = vpop.eup %3697  ;;  %v783_v14 = vrot.slane %v782_v12, 1 }
 0x629   :  { %1100 = vrot.lane.b32.xlu0 %v3698_v13, %s3875_s7 }
 0x62a   :  { %v784_v18 = vmax.f32 %v782_v12, %v783_v14 }
 0x62c   :  { %v4235_v19 = vsel %vm785_vm4, %v775_v16, %v784_v18 }
 0x69b   :  { %v1101_v20 = vpop.permute.xlu0 %1100 }
 0x69c   :  { %v1103_v21 = vmul.f32 %v1101_v20, %v4197_v31 }
 0x69e   :  { %v1105_v23 = vrot.slane %v1103_v21, 2 }
 0x6a0   :  { %1106 = vrot.lane.b32.xlu1 %v1105_v23, %s3876_s29 }
 0x712   :  { %v1107_v24 = vpop.permute.xlu1 %1106 }
 0x713   :  { %3296 = vmatmul.mubr.msk.f32.vlgmr.msra.gmra.mrb[8].mxu1 %vm341_vm7, %v1107_v24 }
 0x714   :  { %3570 = vmatpush3.bf16.msra.mxu1 %v4045_v46  ;;  %3317 = vmatprep.mubr.msk.f32.mxu1 %vm3874_vm6, %v3873_v22 }
 0x715   :  { %3571 = vmatprep.subr.bf16.mxu1 %v3872_v15 }
 0x718   :  { %3573 = vmatpush3.bf16.msra.mxu1 %v4057_v49 }
 0x719   :  { %3580 = vmatprep.subr.bf16.mxu1 %v3872_v15 }
 0x7e6   :  { %v1176_v25 = vpop.f32.mrb[8].mxu1 }
 0x7e7   :  { %v1181_v26 = vrot.slane %v1176_v25, 4  ;;  %v3297_v27 = vpop.f32.mrb[9].mxu1 }
 0x7e9   :  { %v1183_v28 = vadd.f32 %v1181_v26, %v4083_v60 }
 0x7eb   :  { %v2968_v29 = vmul.f32 -1.442695, %v1183_v28 }
 0x7ed   :  { %3699 = vpow2.f32 %v2968_v29 }
 0x7ee   :  { %3701 = vtanh.f32 %v1183_v28 }
 0x7f7   :  { %v3700_v30 = vpop.eup %3699 }
 0x7f8   :  { %v1188_v31 = vadd.f32 1.0, %v3700_v30  ;;  %v3702_v32 = vpop.eup %3701 }
 0x7fa   :  { %3703 = vrcp.f32 %v1188_v31 }
 0x804   :  { %v3704_v33 = vpop.eup %3703 }
 0x805   :  { %v1191_v34 = vsel %vm4088_vm10, %v3702_v32, %v3704_v33 }
 0x806   :  { %1197 = vrot.lane.b32.xlu0 %v1191_v34, %s3875_s7  ;;  %v1195_v38 = vmul.f32 %v1193_v37, %v1191_v34 }
 0x878   :  { %v1198_v35 = vpop.permute.xlu0 %1197 }
 0x879   :  { %v1200_v36 = vmul.f32 %v1198_v35, %v1191_v34 }
 0x87b   :  { %1202 = vrot.lane.b32.xlu1 %v1200_v36, %s3876_s29 }
 0x8ed   :  { %v1203_v39 = vpop.permute.xlu1 %1202 }
 0x8ee   :  { %v1205_v40 = vadd.f32 %v1203_v39, %v1195_v38 }
 0x8f0   :  { %3705 = vtanh.f32 %v1205_v40  ;;  %v1301_v1 = vrot.slane %v1205_v40, 6 }
 0x8fa   :  { %v3706_v41 = vpop.eup %3705 }
 0x8fb   :  { %1208 = vrot.lane.b32.xlu0 %v3706_v41, %s3875_s7 }
 0x96d   :  { %v1209_v42 = vpop.permute.xlu0 %1208 }
 0x96e   :  { %v1211_v43 = vmul.f32 %v1209_v42, %v1191_v34 }
 0x970   :  { %v1213_v44 = vrot.slane %v1211_v43, 4 }
 0x972   :  { %1214 = vrot.lane.b32.xlu1 %v1213_v44, %s3876_s29 }
 0x9e4   :  { %v1215_v45 = vpop.permute.xlu1 %1214 }
 0x9e5   :  { %3307 = vmatmul.mubr.msk.f32.vlgmr.msra.gmra.mrb[14].mxu0 %vm341_vm7, %v1215_v45 }
 0x9e6   :  { %3576 = vmatpush3.bf16.msra.mxu0 %v4045_v46  ;;  %3328 = vmatprep.mubr.msk.f32.mxu0 %vm3874_vm6, %v3873_v22 }
 0x9e7   :  { %3577 = vmatprep.subr.bf16.mxu0 %v3872_v15 }
 0x9ea   :  { %3579 = vmatpush3.bf16.msra.mxu0 %v4057_v49 }
 0x9eb   :  { %3586 = vmatprep.subr.bf16.mxu0 %v3872_v15 }
 0xab8   :  { %v1284_v47 = vpop.f32.mrb[14].mxu0 }
 0xab9   :  { %v1289_v48 = vrot.slane %v1284_v47, 2  ;;  %v3308_v51 = vpop.f32.mrb[15].mxu0 }
 0xabb   :  { %v1291_v52 = vadd.f32 %v1289_v48, %v4083_v60 }
 0xabd   :  { %v2970_v53 = vmul.f32 -1.442695, %v1291_v52 }
 0xabf   :  { %3707 = vpow2.f32 %v2970_v53 }
 0xac0   :  { %3709 = vtanh.f32 %v1291_v52 }
 0xac9   :  { %v3708_v55 = vpop.eup %3707 }
 0xaca   :  { %v1296_v56 = vadd.f32 1.0, %v3708_v55  ;;  %v3710_v58 = vpop.eup %3709 }
 0xacc   :  { %3711 = vrcp.f32 %v1296_v56 }
 0xad6   :  { %v3712_v61 = vpop.eup %3711 }
 0xad7   :  { %v1299_v62 = vsel %vm4088_vm10, %v3710_v58, %v3712_v61 }
 0xad8   :  { %1305 = vrot.lane.b32.xlu0 %v1299_v62, %s3875_s7  ;;  %v1303_v2 = vmul.f32 %v1301_v1, %v1299_v62 }
 0xb4a   :  { %v1306_v63 = vpop.permute.xlu0 %1305 }
 0xb4b   :  { %v1308_v0 = vmul.f32 %v1306_v63, %v1299_v62 }
 0xb4d   :  { %1310 = vrot.lane.b32.xlu1 %v1308_v0, %s3876_s29 }
 0xbbf   :  { %v1311_v60 = vpop.permute.xlu1 %1310 }
 0xbc0   :  { %v1313_v11 = vadd.f32 %v1311_v60, %v1303_v2 }
 0xbc2   :  { %3713 = vtanh.f32 %v1313_v11  ;;  %v1406_v25 = vrot.slane %v1313_v11, 6 }
 0xbcc   :  { %v3714_v3 = vpop.eup %3713 }
 0xbcd   :  { %1316 = vrot.lane.b32.xlu0 %v3714_v3, %s3875_s7 }
 0xc3f   :  { %v1317_v4 = vpop.permute.xlu0 %1316 }
 0xc40   :  { %v1319_v6 = vmul.f32 %v1317_v4, %v1299_v62 }
 0xc42   :  { %v1321_v7 = vrot.slane %v1319_v6, 6 }
 0xc44   :  { %1322 = vrot.lane.b32.xlu1 %v1321_v7, %s3876_s29 }
 0xcb6   :  { %v1323_v8 = vpop.permute.xlu1 %1322 }
 0xcb7   :  { %3318 = vmatmul.mubr.msk.f32.vlgmr.msra.gmra.mrb[10].mxu1 %vm341_vm7, %v1323_v8 }
 0xcb8   :  { %3582 = vmatpush3.bf16.msra.mxu1 %v4045_v46  ;;  %3339 = vmatprep.mubr.msk.f32.mxu1 %vm3874_vm6, %v3873_v22 }
 0xcb9   :  { %3583 = vmatprep.subr.bf16.mxu1 %v3872_v15 }
 0xcbc   :  { %3585 = vmatpush3.bf16.msra.mxu1 %v4057_v49 }
 0xcbd   :  { %3592 = vmatprep.subr.bf16.mxu1 %v3872_v15 }
 0xd8a   :  { %v1392_v9 = vpop.f32.mrb[10].mxu1 }
 0xd8b   :  { %v1396_v10 = vadd.f32 %v1392_v9, %v4077_v54  ;;  %v3319_v12 = vpop.f32.mrb[11].mxu1 }
 0xd8d   :  { %v2972_v13 = vmul.f32 -1.442695, %v1396_v10 }
 0xd8f   :  { %3715 = vpow2.f32 %v2972_v13 }
 0xd90   :  { %3717 = vtanh.f32 %v1396_v10 }
 0xd99   :  { %v3716_v14 = vpop.eup %3715 }
 0xd9a   :  { %v1401_v16 = vadd.f32 1.0, %v3716_v14  ;;  %v3718_v18 = vpop.eup %3717 }
 0xd9c   :  { %3719 = vrcp.f32 %v1401_v16 }
 0xda6   :  { %v3720_v20 = vpop.eup %3719 }
 0xda7   :  { %v1404_v21 = vsel %vm4088_vm10, %v3718_v18, %v3720_v20 }
 0xda8   :  { %1410 = vrot.lane.b32.xlu0 %v1404_v21, %s3875_s7  ;;  %v1408_v26 = vmul.f32 %v1406_v25, %v1404_v21 }
 0xe1a   :  { %v1411_v23 = vpop.permute.xlu0 %1410 }
 0xe1b   :  { %v1413_v24 = vmul.f32 %v1411_v23, %v1404_v21 }
 0xe1d   :  { %1415 = vrot.lane.b32.xlu1 %v1413_v24, %s3876_s29 }
 0xe8f   :  { %v1416_v27 = vpop.permute.xlu1 %1415 }
 0xe90   :  { %v1418_v28 = vadd.f32 %v1416_v27, %v1408_v26 }
 0xe92   :  { %3721 = vtanh.f32 %v1418_v28  ;;  %v1513_v45 = vrot.slane %v1418_v28, 6 }
 0xe9c   :  { %v3722_v29 = vpop.eup %3721 }
 0xe9d   :  { %1421 = vrot.lane.b32.xlu0 %v3722_v29, %s3875_s7 }
 0xf0f   :  { %v1422_v30 = vpop.permute.xlu0 %1421 }
 0xf10   :  { %v1424_v31 = vmul.f32 %v1422_v30, %v1404_v21 }
 0xf12   :  { %1426 = vrot.lane.b32.xlu1 %v1424_v31, %s3876_s29 }
 0xf84   :  { %v1427_v32 = vpop.permute.xlu1 %1426 }
 0xf85   :  { %3329 = vmatmul.mubr.msk.f32.vlgmr.msra.gmra.mrb[16].mxu0 %vm341_vm7, %v1427_v32 }
 0xf86   :  { %3588 = vmatpush3.bf16.msra.mxu0 %v4045_v46  ;;  %3350 = vmatprep.mubr.msk.f32.mxu0 %vm3874_vm6, %v3873_v22 }
 0xf87   :  { %3589 = vmatprep.subr.bf16.mxu0 %v3872_v15 }
 0xf8a   :  { %3591 = vmatpush3.bf16.msra.mxu0 %v4057_v49 }
 0xf8b   :  { %3598 = vmatprep.subr.bf16.mxu0 %v3872_v15 }
0x1058   :  { %v1496_v33 = vpop.f32.mrb[16].mxu0 }
0x1059   :  { %v1501_v34 = vrot.slane %v1496_v33, 6  ;;  %v3330_v35 = vpop.f32.mrb[17].mxu0 }
0x105b   :  { %v1503_v36 = vadd.f32 %v1501_v34, %v4077_v54 }
0x105d   :  { %v2974_v37 = vmul.f32 -1.442695, %v1503_v36 }
0x105f   :  { %3723 = vpow2.f32 %v2974_v37 }
0x1060   :  { %3725 = vtanh.f32 %v1503_v36 }
0x1069   :  { %v3724_v38 = vpop.eup %3723 }
0x106a   :  { %v1508_v39 = vadd.f32 1.0, %v3724_v38  ;;  %v3726_v40 = vpop.eup %3725 }
0x106c   :  { %3727 = vrcp.f32 %v1508_v39 }
0x1076   :  { %v3728_v41 = vpop.eup %3727 }
0x1077   :  { %v1511_v42 = vsel %vm4088_vm10, %v3726_v40, %v3728_v41 }
0x1078   :  { %1517 = vrot.lane.b32.xlu0 %v1511_v42, %s3875_s7  ;;  %v1515_v47 = vmul.f32 %v1513_v45, %v1511_v42 }
0x10ea   :  { %v1518_v43 = vpop.permute.xlu0 %1517 }
0x10eb   :  { %v1520_v44 = vmul.f32 %v1518_v43, %v1511_v42 }
0x10ed   :  { %1522 = vrot.lane.b32.xlu1 %v1520_v44, %s3876_s29 }
0x115f   :  { %v1523_v48 = vpop.permute.xlu1 %1522 }
0x1160   :  { %v1525_v51 = vadd.f32 %v1523_v48, %v1515_v47 }
0x1162   :  { %3729 = vtanh.f32 %v1525_v51  ;;  %v1621_v8 = vrot.slane %v1525_v51, 6 }
0x116c   :  { %v3730_v52 = vpop.eup %3729 }
0x116d   :  { %1528 = vrot.lane.b32.xlu0 %v3730_v52, %s3875_s7 }
0x11df   :  { %v1529_v53 = vpop.permute.xlu0 %1528 }
0x11e0   :  { %v1531_v55 = vmul.f32 %v1529_v53, %v1511_v42 }
0x11e2   :  { %v1533_v56 = vrot.slane %v1531_v55, 2 }
0x11e4   :  { %1534 = vrot.lane.b32.xlu1 %v1533_v56, %s3876_s29 }
0x1256   :  { %v1535_v58 = vpop.permute.xlu1 %1534 }
0x1257   :  { %3340 = vmatmul.mubr.msk.f32.vlgmr.msra.gmra.mrb[12].mxu1 %vm341_vm7, %v1535_v58 }
0x1258   :  { %3594 = vmatpush3.bf16.msra.mxu1 %v4045_v46  ;;  %3361 = vmatprep.mubr.msk.f32.mxu1 %vm3874_vm6, %v3873_v22 }
0x1259   :  { %3595 = vmatprep.subr.bf16.mxu1 %v3872_v15 }
0x125c   :  { %3597 = vmatpush3.bf16.msra.mxu1 %v4057_v49 }
0x125d   :  { %3604 = vmatprep.subr.bf16.mxu1 %v3872_v15 }
0x132a   :  { %v1604_v61 = vpop.f32.mrb[12].mxu1 }
0x132b   :  { %v1609_v62 = vrot.slane %v1604_v61, 4  ;;  %v3341_v63 = vpop.f32.mrb[13].mxu1 }
0x132d   :  { %v1611_v0 = vadd.f32 %v1609_v62, %v4077_v54 }
0x132f   :  { %v2976_v1 = vmul.f32 -1.442695, %v1611_v0 }
0x1331   :  { %3731 = vpow2.f32 %v2976_v1 }
0x1332   :  { %3733 = vtanh.f32 %v1611_v0 }
0x133b   :  { %v3732_v2 = vpop.eup %3731 }
0x133c   :  { %v1616_v60 = vadd.f32 1.0, %v3732_v2  ;;  %v3734_v11 = vpop.eup %3733 }
0x133e   :  { %3735 = vrcp.f32 %v1616_v60 }
0x1348   :  { %v3736_v3 = vpop.eup %3735 }
0x1349   :  { %v1619_v4 = vsel %vm4088_vm10, %v3734_v11, %v3736_v3 }
0x134a   :  { %1625 = vrot.lane.b32.xlu0 %v1619_v4, %s3875_s7  ;;  %v1623_v9 = vmul.f32 %v1621_v8, %v1619_v4 }
0x13bc   :  { %v1626_v6 = vpop.permute.xlu0 %1625 }
0x13bd   :  { %v1628_v7 = vmul.f32 %v1626_v6, %v1619_v4 }
0x13bf   :  { %1630 = vrot.lane.b32.xlu1 %v1628_v7, %s3876_s29 }
0x1431   :  { %v1631_v10 = vpop.permute.xlu1 %1630 }
0x1432   :  { %v1633_v12 = vadd.f32 %v1631_v10, %v1623_v9 }
0x1434   :  { %3737 = vtanh.f32 %v1633_v12  ;;  %v1729_v34 = vrot.slane %v1633_v12, 6 }
0x143e   :  { %v3738_v13 = vpop.eup %3737 }
0x143f   :  { %1636 = vrot.lane.b32.xlu0 %v3738_v13, %s3875_s7 }
0x14b1   :  { %v1637_v14 = vpop.permute.xlu0 %1636 }
0x14b2   :  { %v1639_v16 = vmul.f32 %v1637_v14, %v1619_v4 }
0x14b4   :  { %v1641_v18 = vrot.slane %v1639_v16, 4 }
0x14b6   :  { %1642 = vrot.lane.b32.xlu1 %v1641_v18, %s3876_s29 }
0x1528   :  { %v1643_v20 = vpop.permute.xlu1 %1642 }
0x1529   :  { %3351 = vmatmul.mubr.msk.f32.vlgmr.msra.gmra.mrb[18].mxu0 %vm341_vm7, %v1643_v20 }
0x152a   :  { %3600 = vmatpush3.bf16.msra.mxu0 %v4045_v46  ;;  %3372 = vmatprep.mubr.msk.f32.mxu0 %vm3874_vm6, %v3873_v22 }
0x152b   :  { %3601 = vmatprep.subr.bf16.mxu0 %v3872_v15 }
0x152e   :  { %3603 = vmatpush3.bf16.msra.mxu0 %v4057_v49 }
0x152f   :  { %3610 = vmatprep.subr.bf16.mxu0 %v3872_v15 }
0x15fc   :  { %v1712_v21 = vpop.f32.mrb[18].mxu0 }
0x15fd   :  { %v1717_v23 = vrot.slane %v1712_v21, 2  ;;  %v3352_v24 = vpop.f32.mrb[19].mxu0 }
0x15ff   :  { %v1719_v25 = vadd.f32 %v1717_v23, %v4077_v54 }
0x1601   :  { %v2978_v26 = vmul.f32 -1.442695, %v1719_v25 }
0x1603   :  { %3739 = vpow2.f32 %v2978_v26 }
0x1604   :  { %3741 = vtanh.f32 %v1719_v25 }
0x160d   :  { %v3740_v27 = vpop.eup %3739 }
0x160e   :  { %v1724_v28 = vadd.f32 1.0, %v3740_v27  ;;  %v3742_v29 = vpop.eup %3741 }
0x1610   :  { %3743 = vrcp.f32 %v1724_v28 }
0x161a   :  { %v3744_v30 = vpop.eup %3743 }
0x161b   :  { %v1727_v31 = vsel %vm4088_vm10, %v3742_v29, %v3744_v30 }
0x161c   :  { %1733 = vrot.lane.b32.xlu0 %v1727_v31, %s3875_s7  ;;  %v1731_v35 = vmul.f32 %v1729_v34, %v1727_v31 }
0x168e   :  { %v1734_v32 = vpop.permute.xlu0 %1733 }
0x168f   :  { %v1736_v33 = vmul.f32 %v1734_v32, %v1727_v31 }
0x1691   :  { %1738 = vrot.lane.b32.xlu1 %v1736_v33, %s3876_s29 }
0x1703   :  { %v1739_v54 = vpop.permute.xlu1 %1738 }
0x1704   :  { %v1741_v36 = vadd.f32 %v1739_v54, %v1731_v35 }
0x1706   :  { %3745 = vtanh.f32 %v1741_v36  ;;  %v1834_v58 = vrot.slane %v1741_v36, 6 }
0x1710   :  { %v3746_v37 = vpop.eup %3745 }
0x1711   :  { %1744 = vrot.lane.b32.xlu0 %v3746_v37, %s3875_s7 }
0x1783   :  { %v1745_v38 = vpop.permute.xlu0 %1744 }
0x1784   :  { %v1747_v39 = vmul.f32 %v1745_v38, %v1727_v31 }
0x1786   :  { %v1749_v40 = vrot.slane %v1747_v39, 6 }
0x1788   :  { %1750 = vrot.lane.b32.xlu1 %v1749_v40, %s3876_s29 }
0x17fa   :  { %v1751_v41 = vpop.permute.xlu1 %1750 }
0x17fb   :  { %3362 = vmatmul.mubr.msk.f32.vlgmr.msra.gmra.mrb[14].mxu1 %vm341_vm7, %v1751_v41 }
0x17fc   :  { %3606 = vmatpush3.bf16.msra.mxu1 %v4045_v46  ;;  %3383 = vmatprep.mubr.msk.f32.mxu1 %vm3874_vm6, %v3873_v22 }
0x17fd   :  { %3607 = vmatprep.subr.bf16.mxu1 %v3872_v15 }
0x1800   :  { %3609 = vmatpush3.bf16.msra.mxu1 %v4057_v49 }
0x1801   :  { %3616 = vmatprep.subr.bf16.mxu1 %v3872_v15 }
0x18ce   :  { %v1820_v42 = vpop.f32.mrb[14].mxu1 }
0x18cf   :  { %v1824_v43 = vadd.f32 %v1820_v42, %v4081_v59  ;;  %v3363_v44 = vpop.f32.mrb[15].mxu1 }
0x18d1   :  { %v2980_v45 = vmul.f32 -1.442695, %v1824_v43 }
0x18d3   :  { %3747 = vpow2.f32 %v2980_v45 }
0x18d4   :  { %3749 = vtanh.f32 %v1824_v43 }
0x18dd   :  { %v3748_v47 = vpop.eup %3747 }
0x18de   :  { %v1829_v48 = vadd.f32 1.0, %v3748_v47  ;;  %v3750_v51 = vpop.eup %3749 }
0x18e0   :  { %3751 = vrcp.f32 %v1829_v48 }
0x18ea   :  { %v3752_v52 = vpop.eup %3751 }
0x18eb   :  { %v1832_v53 = vsel %vm4088_vm10, %v3750_v51, %v3752_v52 }
0x18ec   :  { %1838 = vrot.lane.b32.xlu0 %v1832_v53, %s3875_s7  ;;  %v1836_v61 = vmul.f32 %v1834_v58, %v1832_v53 }
0x195e   :  { %v1839_v55 = vpop.permute.xlu0 %1838 }
0x195f   :  { %v1841_v56 = vmul.f32 %v1839_v55, %v1832_v53 }
0x1961   :  { %1843 = vrot.lane.b32.xlu1 %v1841_v56, %s3876_s29 }
0x19d3   :  { %v1844_v62 = vpop.permute.xlu1 %1843 }
0x19d4   :  { %v1846_v63 = vadd.f32 %v1844_v62, %v1836_v61 }
0x19d6   :  { %3753 = vtanh.f32 %v1846_v63  ;;  %v1941_v18 = vrot.slane %v1846_v63, 6 }
0x19e0   :  { %v3754_v0 = vpop.eup %3753 }
0x19e1   :  { %1849 = vrot.lane.b32.xlu0 %v3754_v0, %s3875_s7 }
0x1a53   :  { %v1850_v1 = vpop.permute.xlu0 %1849 }
0x1a54   :  { %v1852_v2 = vmul.f32 %v1850_v1, %v1832_v53 }
0x1a56   :  { %1854 = vrot.lane.b32.xlu1 %v1852_v2, %s3876_s29 }
0x1ac8   :  { %v1855_v60 = vpop.permute.xlu1 %1854 }
0x1ac9   :  { %3373 = vmatmul.mubr.msk.f32.vlgmr.msra.gmra.mrb[20].mxu0 %vm341_vm7, %v1855_v60 }
0x1aca   :  { %3612 = vmatpush3.bf16.msra.mxu0 %v4045_v46  ;;  %3394 = vmatprep.mubr.msk.f32.mxu0 %vm3874_vm6, %v3873_v22 }
0x1acb   :  { %3613 = vmatprep.subr.bf16.mxu0 %v3872_v15 }
0x1ace   :  { %3615 = vmatpush3.bf16.msra.mxu0 %v4057_v49 }
0x1acf   :  { %3622 = vmatprep.subr.bf16.mxu0 %v3872_v15 }
0x1b9c   :  { %v1924_v11 = vpop.f32.mrb[20].mxu0 }
0x1b9d   :  { %v1929_v3 = vrot.slane %v1924_v11, 6  ;;  %v3374_v4 = vpop.f32.mrb[21].mxu0 }
0x1b9f   :  { %v1931_v6 = vadd.f32 %v1929_v3, %v4081_v59 }
0x1ba1   :  { %v2982_v7 = vmul.f32 -1.442695, %v1931_v6 }
0x1ba3   :  { %3755 = vpow2.f32 %v2982_v7 }
0x1ba4   :  { %3757 = vtanh.f32 %v1931_v6 }
0x1bad   :  { %v3756_v8 = vpop.eup %3755 }
0x1bae   :  { %v1936_v9 = vadd.f32 1.0, %v3756_v8  ;;  %v3758_v10 = vpop.eup %3757 }
0x1bb0   :  { %3759 = vrcp.f32 %v1936_v9 }
0x1bba   :  { %v3760_v12 = vpop.eup %3759 }
0x1bbb   :  { %v1939_v13 = vsel %vm4088_vm10, %v3758_v10, %v3760_v12 }
0x1bbc   :  { %1945 = vrot.lane.b32.xlu0 %v1939_v13, %s3875_s7  ;;  %v1943_v20 = vmul.f32 %v1941_v18, %v1939_v13 }
0x1c2e   :  { %v1946_v14 = vpop.permute.xlu0 %1945 }
0x1c2f   :  { %v1948_v16 = vmul.f32 %v1946_v14, %v1939_v13 }
0x1c31   :  { %1950 = vrot.lane.b32.xlu1 %v1948_v16, %s3876_s29 }
0x1ca3   :  { %v1951_v21 = vpop.permute.xlu1 %1950 }
0x1ca4   :  { %v1953_v23 = vadd.f32 %v1951_v21, %v1943_v20 }
0x1ca6   :  { %3761 = vtanh.f32 %v1953_v23  ;;  %v2049_v40 = vrot.slane %v1953_v23, 6 }
0x1cb0   :  { %v3762_v24 = vpop.eup %3761 }
0x1cb1   :  { %1956 = vrot.lane.b32.xlu0 %v3762_v24, %s3875_s7 }
0x1d23   :  { %v1957_v25 = vpop.permute.xlu0 %1956 }
0x1d24   :  { %v1959_v26 = vmul.f32 %v1957_v25, %v1939_v13 }
0x1d26   :  { %v1961_v27 = vrot.slane %v1959_v26, 2 }
0x1d28   :  { %1962 = vrot.lane.b32.xlu1 %v1961_v27, %s3876_s29 }
0x1d9a   :  { %v1963_v28 = vpop.permute.xlu1 %1962 }
0x1d9b   :  { %3384 = vmatmul.mubr.msk.f32.vlgmr.msra.gmra.mrb[16].mxu1 %vm341_vm7, %v1963_v28 }
0x1d9c   :  { %3618 = vmatpush3.bf16.msra.mxu1 %v4045_v46  ;;  %3405 = vmatprep.mubr.msk.f32.mxu1 %vm3874_vm6, %v3873_v22 }
0x1d9d   :  { %3619 = vmatprep.subr.bf16.mxu1 %v3872_v15 }
0x1da0   :  { %3621 = vmatpush3.bf16.msra.mxu1 %v4057_v49 }
0x1da1   :  { %3628 = vmatprep.subr.bf16.mxu1 %v3872_v15 }
0x1e6e   :  { %v2032_v29 = vpop.f32.mrb[16].mxu1 }
0x1e6f   :  { %v2037_v30 = vrot.slane %v2032_v29, 4  ;;  %v3385_v31 = vpop.f32.mrb[17].mxu1 }
0x1e71   :  { %v2039_v32 = vadd.f32 %v2037_v30, %v4081_v59 }
0x1e73   :  { %v2984_v33 = vmul.f32 -1.442695, %v2039_v32 }
0x1e75   :  { %3763 = vpow2.f32 %v2984_v33 }
0x1e76   :  { %3765 = vtanh.f32 %v2039_v32 }
0x1e7f   :  { %v3764_v34 = vpop.eup %3763 }
0x1e80   :  { %v2044_v35 = vadd.f32 1.0, %v3764_v34  ;;  %v3766_v54 = vpop.eup %3765 }
0x1e82   :  { %3767 = vrcp.f32 %v2044_v35 }
0x1e8c   :  { %v3768_v36 = vpop.eup %3767 }
0x1e8d   :  { %v2047_v37 = vsel %vm4088_vm10, %v3766_v54, %v3768_v36 }
0x1e8e   :  { %2053 = vrot.lane.b32.xlu0 %v2047_v37, %s3875_s7  ;;  %v2051_v41 = vmul.f32 %v2049_v40, %v2047_v37 }
0x1f00   :  { %v2054_v38 = vpop.permute.xlu0 %2053 }
0x1f01   :  { %v2056_v39 = vmul.f32 %v2054_v38, %v2047_v37 }
0x1f03   :  { %2058 = vrot.lane.b32.xlu1 %v2056_v39, %s3876_s29 }
0x1f75   :  { %v2059_v42 = vpop.permute.xlu1 %2058 }
0x1f76   :  { %v2061_v43 = vadd.f32 %v2059_v42, %v2051_v41 }
0x1f78   :  { %3769 = vtanh.f32 %v2061_v43  ;;  %v2157_v11 = vrot.slane %v2061_v43, 6 }
0x1f82   :  { %v3770_v44 = vpop.eup %3769 }
0x1f83   :  { %2064 = vrot.lane.b32.xlu0 %v3770_v44, %s3875_s7 }
0x1ff5   :  { %v2065_v45 = vpop.permute.xlu0 %2064 }
0x1ff6   :  { %v2067_v47 = vmul.f32 %v2065_v45, %v2047_v37 }
0x1ff8   :  { %v2069_v48 = vrot.slane %v2067_v47, 4 }
0x1ffa   :  { %2070 = vrot.lane.b32.xlu1 %v2069_v48, %s3876_s29 }
0x206c   :  { %v2071_v51 = vpop.permute.xlu1 %2070 }
0x206d   :  { %3395 = vmatmul.mubr.msk.f32.vlgmr.msra.gmra.mrb[22].mxu0 %vm341_vm7, %v2071_v51 }
0x206e   :  { %3624 = vmatpush3.bf16.msra.mxu0 %v4045_v46  ;;  %3416 = vmatprep.mubr.msk.f32.mxu0 %vm3874_vm6, %v3873_v22 }
0x206f   :  { %3625 = vmatprep.subr.bf16.mxu0 %v3872_v15 }
0x2072   :  { %3627 = vmatpush3.bf16.msra.mxu0 %v4057_v49 }
0x2073   :  { %3634 = vmatprep.subr.bf16.mxu0 %v3872_v15 }
0x2140   :  { %v2140_v52 = vpop.f32.mrb[22].mxu0 }
0x2141   :  { %v2145_v53 = vrot.slane %v2140_v52, 2  ;;  %v3396_v55 = vpop.f32.mrb[23].mxu0 }
0x2143   :  { %v2147_v56 = vadd.f32 %v2145_v53, %v4081_v59 }
0x2145   :  { %v2986_v58 = vmul.f32 -1.442695, %v2147_v56 }
0x2147   :  { %3771 = vpow2.f32 %v2986_v58 }
0x2148   :  { %3773 = vtanh.f32 %v2147_v56 }
0x2151   :  { %v3772_v61 = vpop.eup %3771 }
0x2152   :  { %v2152_v62 = vadd.f32 1.0, %v3772_v61  ;;  %v3774_v63 = vpop.eup %3773 }
0x2154   :  { %3775 = vrcp.f32 %v2152_v62 }
0x215e   :  { %v3776_v0 = vpop.eup %3775 }
0x215f   :  { %v2155_v1 = vsel %vm4088_vm10, %v3774_v63, %v3776_v0 }
0x2160   :  { %2161 = vrot.lane.b32.xlu0 %v2155_v1, %s3875_s7  ;;  %v2159_v3 = vmul.f32 %v2157_v11, %v2155_v1 }
0x21d2   :  { %v2162_v2 = vpop.permute.xlu0 %2161 }
0x21d3   :  { %v2164_v60 = vmul.f32 %v2162_v2, %v2155_v1 }
0x21d5   :  { %2166 = vrot.lane.b32.xlu1 %v2164_v60, %s3876_s29 }
0x2247   :  { %v2167_v59 = vpop.permute.xlu1 %2166 }
0x2248   :  { %v2169_v4 = vadd.f32 %v2167_v59, %v2159_v3 }
0x224a   :  { %3777 = vtanh.f32 %v2169_v4  ;;  %v2262_v27 = vrot.slane %v2169_v4, 6 }
0x2254   :  { %v3778_v6 = vpop.eup %3777 }
0x2255   :  { %2172 = vrot.lane.b32.xlu0 %v3778_v6, %s3875_s7 }
0x22c7   :  { %v2173_v7 = vpop.permute.xlu0 %2172 }
0x22c8   :  { %v2175_v8 = vmul.f32 %v2173_v7, %v2155_v1 }
0x22ca   :  { %v2177_v9 = vrot.slane %v2175_v8, 6 }
0x22cc   :  { %2178 = vrot.lane.b32.xlu1 %v2177_v9, %s3876_s29 }
0x233e   :  { %v2179_v10 = vpop.permute.xlu1 %2178 }
0x233f   :  { %3406 = vmatmul.mubr.msk.f32.vlgmr.msra.gmra.mrb[18].mxu1 %vm341_vm7, %v2179_v10 }
0x2340   :  { %3630 = vmatpush3.bf16.msra.mxu1 %v4045_v46  ;;  %3427 = vmatprep.mubr.msk.f32.mxu1 %vm3874_vm6, %v3873_v22 }
0x2341   :  { %3631 = vmatprep.subr.bf16.mxu1 %v3872_v15 }
0x2344   :  { %3633 = vmatpush3.bf16.msra.mxu1 %v4057_v49 }
0x2345   :  { %3640 = vmatprep.subr.bf16.mxu1 %v3872_v15 }
0x2412   :  { %v2248_v12 = vpop.f32.mrb[18].mxu1 }
0x2413   :  { %v2252_v13 = vadd.f32 %v2248_v12, %v4079_v57  ;;  %v3407_v14 = vpop.f32.mrb[19].mxu1 }
0x2415   :  { %v2988_v16 = vmul.f32 -1.442695, %v2252_v13 }
0x2417   :  { %3779 = vpow2.f32 %v2988_v16  ;;  %v2604_v16 = vld [vmem:[%s4551_s12] sm:$0xff] }
0x2418   :  { %3781 = vtanh.f32 %v2252_v13 }
0x2421   :  { %v3780_v18 = vpop.eup %3779 }
0x2422   :  { %v2257_v20 = vadd.f32 1.0, %v3780_v18  ;;  %v3782_v21 = vpop.eup %3781  ;;  %v2605_v18 = vld [vmem:[%s4551_s12 + $0x8] sm:$0xff] }
0x2424   :  { %3783 = vrcp.f32 %v2257_v20  ;;  %v3647_v20 = vpack.c.bf16 %v2605_v18, %v2604_v16 }
0x242e   :  { %v3784_v23 = vpop.eup %3783 }
0x242f   :  { %v2260_v24 = vsel %vm4088_vm10, %v3782_v21, %v3784_v23  ;;  %v2606_v21 = vld [vmem:[%s4551_s12 + $0x10] sm:$0xff]  ;;  %v2607_v23 = vld [vmem:[%s4551_s12 + $0x18] sm:$0xff] }
0x2430   :  { %2266 = vrot.lane.b32.xlu0 %v2260_v24, %s3875_s7  ;;  %v2264_v28 = vmul.f32 %v2262_v27, %v2260_v24  ;;  %v2609_v27 = vld [vmem:[%s4551_s12 + $0x28] sm:$0xff] }
0x24a2   :  { %v2267_v25 = vpop.permute.xlu0 %2266 }
0x24a3   :  { %v2269_v26 = vmul.f32 %v2267_v25, %v2260_v24  ;;  %v3650_v25 = vpack.c.bf16 %v2607_v23, %v2606_v21 }
0x24a5   :  { %2271 = vrot.lane.b32.xlu1 %v2269_v26, %s3876_s29  ;;  %v2608_v26 = vld [vmem:[%s4551_s12 + $0x20] sm:$0xff] }
0x2517   :  { %v2272_v29 = vpop.permute.xlu1 %2271 }
0x2518   :  { %v2274_v30 = vadd.f32 %v2272_v29, %v2264_v28  ;;  %v3653_v28 = vpack.c.bf16 %v2609_v27, %v2608_v26  ;;  %v2610_v29 = vld [vmem:[%s4551_s12 + $0x30] sm:$0xff] }
0x251a   :  { %3785 = vtanh.f32 %v2274_v30  ;;  %v2369_v44 = vrot.slane %v2274_v30, 6  ;;  %v2611_v30 = vld [vmem:[%s4551_s12 + $0x38] sm:$0xff] }
0x2524   :  { %v3786_v31 = vpop.eup %3785 }
0x2525   :  { %2277 = vrot.lane.b32.xlu0 %v3786_v31, %s3875_s7  ;;  %v3656_v31 = vpack.c.bf16 %v2611_v30, %v2610_v29 }
0x2597   :  { %v2278_v32 = vpop.permute.xlu0 %2277 }
0x2598   :  { %v2280_v33 = vmul.f32 %v2278_v32, %v2260_v24  ;;  %v2935_v32 = vld [vmem:[%s4548_s9] ss:$0 sm:$0xff]  ;;  %s3877_s9 = smov 96  }
0x259a   :  { %2282 = vrot.lane.b32.xlu1 %v2280_v33, %s3876_s29  ;;  %v411_v33 = vadd.f32 %v2935_v32, %v4072_v50 }
0x260c   :  { %v2283_v34 = vpop.permute.xlu1 %2282 }
0x260d   :  { %3417 = vmatmul.mubr.msk.f32.vlgmr.msra.gmra.mrb[24].mxu0 %vm341_vm7, %v2283_v34 }
0x260e   :  { %3636 = vmatpush3.bf16.msra.mxu0 %v4045_v46  ;;  %3438 = vmatprep.mubr.msk.f32.mxu0 %vm3874_vm6, %v3873_v22 }
0x260f   :  { %3637 = vmatprep.subr.bf16.mxu0 %v3872_v15 }
0x2612   :  { %3639 = vmatpush3.bf16.msra.mxu0 %v4057_v49 }
0x2613   :  { %3646 = vmatprep.subr.bf16.mxu0 %v3872_v15 }
0x26e0   :  { %v2352_v35 = vpop.f32.mrb[24].mxu0 }
0x26e1   :  { %v2357_v54 = vrot.slane %v2352_v35, 6  ;;  %v3418_v36 = vpop.f32.mrb[25].mxu0  ;;  %v2937_v35 = vmul.f32 -1.442695, %v411_v33 }
0x26e3   :  { %v2359_v37 = vadd.f32 %v2357_v54, %v4079_v57 }
0x26e5   :  { %v2990_v38 = vmul.f32 -1.442695, %v2359_v37 }
0x26e7   :  { %3787 = vpow2.f32 %v2990_v38 }
0x26e8   :  { %3789 = vtanh.f32 %v2359_v37 }
0x26f1   :  { %v3788_v39 = vpop.eup %3787 }
0x26f2   :  { %v2364_v40 = vadd.f32 1.0, %v3788_v39  ;;  %v3790_v46 = vpop.eup %3789 }
0x26f4   :  { %3791 = vrcp.f32 %v2364_v40 }
0x26fe   :  { %v3792_v41 = vpop.eup %3791 }
0x26ff   :  { %v2367_v42 = vsel %vm4088_vm10, %v3790_v46, %v3792_v41 }
0x2700   :  { %2373 = vrot.lane.b32.xlu0 %v2367_v42, %s3875_s7  ;;  %v2371_v45 = vmul.f32 %v2369_v44, %v2367_v42 }
0x2772   :  { %v2374_v49 = vpop.permute.xlu0 %2373 }
0x2773   :  { %v2376_v43 = vmul.f32 %v2374_v49, %v2367_v42 }
0x2775   :  { %2378 = vrot.lane.b32.xlu1 %v2376_v43, %s3876_s29 }
0x27e7   :  { %v2379_v47 = vpop.permute.xlu1 %2378 }
0x27e8   :  { %v2381_v48 = vadd.f32 %v2379_v47, %v2371_v45 }
0x27ea   :  { %3793 = vtanh.f32 %v2381_v48  ;;  %v2477_v6 = vrot.slane %v2381_v48, 6 }
0x27f4   :  { %v3794_v51 = vpop.eup %3793 }
0x27f5   :  { %2384 = vrot.lane.b32.xlu0 %v3794_v51, %s3875_s7 }
0x2867   :  { %v2385_v52 = vpop.permute.xlu0 %2384 }
0x2868   :  { %v2387_v53 = vmul.f32 %v2385_v52, %v2367_v42 }
0x286a   :  { %v2389_v55 = vrot.slane %v2387_v53, 2 }
0x286c   :  { %2390 = vrot.lane.b32.xlu1 %v2389_v55, %s3876_s29 }
0x28de   :  { %v2391_v56 = vpop.permute.xlu1 %2390 }
0x28df   :  { %3428 = vmatmul.mubr.msk.f32.vlgmr.msra.gmra.mrb[20].mxu1 %vm341_vm7, %v2391_v56 }
0x28e0   :  { %3449 = vmatprep.mubr.msk.f32.mxu1 %vm3874_vm6, %v3873_v22 }
0x29b2   :  { %v2460_v58 = vpop.f32.mrb[20].mxu1 }
0x29b3   :  { %v2465_v61 = vrot.slane %v2460_v58, 4  ;;  %v3429_v62 = vpop.f32.mrb[21].mxu1 }
0x29b4   :  { %v2613_v62 = vld [vmem:[%s4551_s12 + $0x48] sm:$0xff] }
0x29b5   :  { %v2467_v63 = vadd.f32 %v2465_v61, %v4079_v57 }
0x29b7   :  { %v2992_v0 = vmul.f32 -1.442695, %v2467_v63 }
0x29b9   :  { %3795 = vpow2.f32 %v2992_v0  ;;  %v3641_v0 = vpack.c.bf16 %v2613_v62, %v2612_v5 }
0x29ba   :  { %3797 = vtanh.f32 %v2467_v63  ;;  %v2614_v63 = vld [vmem:[%s4551_s12 + $0x50] sm:$0xff] }
0x29bb   :  { %3642 = vmatpush3.bf16.msra.mxu1 %v3641_v0 }
0x29bc   :  { %3643 = vmatprep.subr.bf16.mxu1 %v3872_v15 }
0x29c3   :  { %v3796_v1 = vpop.eup %3795 }
0x29c4   :  { %v2472_v2 = vadd.f32 1.0, %v3796_v1  ;;  %v3798_v60 = vpop.eup %3797  ;;  %v2615_v1 = vld [vmem:[%s4551_s12 + $0x58] sm:$0xff] }
0x29c6   :  { %3799 = vrcp.f32 %v2472_v2  ;;  %v3644_v2 = vpack.c.bf16 %v2615_v1, %v2614_v63 }
0x29c8   :  { %3645 = vmatpush3.bf16.msra.mxu1 %v3644_v2 }
0x29c9   :  { %3658 = vmatprep.subr.bf16.mxu1 %v3872_v15 }
0x29d0   :  { %v3800_v11 = vpop.eup %3799 }
0x29d1   :  { %v2475_v3 = vsel %vm4088_vm10, %v3798_v60, %v3800_v11 }
0x29d2   :  { %2481 = vrot.lane.b32.xlu0 %v2475_v3, %s3875_s7  ;;  %v2479_v7 = vmul.f32 %v2477_v6, %v2475_v3 }
0x2a44   :  { %v2482_v59 = vpop.permute.xlu0 %2481 }
0x2a45   :  { %v2484_v4 = vmul.f32 %v2482_v59, %v2475_v3 }
0x2a47   :  { %2486 = vrot.lane.b32.xlu1 %v2484_v4, %s3876_s29 }
0x2ab9   :  { %v2487_v8 = vpop.permute.xlu1 %2486 }
0x2aba   :  { %v4415_v9 = vadd.f32 %v2487_v8, %v2479_v7  ;;  %v2616_v7 = vld [vmem:[%s4551_s12 + $0x60] sm:$0xff]  ;;  %v2617_v8 = vld [vmem:[%s4551_s12 + $0x68] sm:$0xff] }
0x2abc   :  { %3801 = vtanh.f32 %v4415_v9  ;;  %v2585_v55 = vrot.slane %v4415_v9, 6  ;;  %v3659_v9 = vpack.c.bf16 %v2617_v8, %v2616_v7 }
0x2abd   :  { %3803 = vpow2.f32 %v2937_v35 }
0x2ac6   :  { %v3802_v10 = vpop.eup %3801 }
0x2ac7   :  { %2492 = vrot.lane.b32.xlu0 %v3802_v10, %s3875_s7  ;;  %v3804_v39 = vpop.eup %3803  ;;  %v2618_v10 = vld [vmem:[%s4551_s12 + $0x70] sm:$0xff] }
0x2ac8   :  { %v418_v41 = vadd.f32 1.0, %v3804_v39 }
0x2b39   :  { %v2493_v12 = vpop.permute.xlu0 %2492 }
0x2b3a   :  { %v2495_v13 = vmul.f32 %v2493_v12, %v2475_v3  ;;  %v2619_v12 = vld [vmem:[%s4551_s12 + $0x78] sm:$0xff] }
0x2b3c   :  { %v2497_v14 = vrot.slane %v2495_v13, 4 }
0x2b3e   :  { %2498 = vrot.lane.b32.xlu1 %v2497_v14, %s3876_s29  ;;  %v3662_v14 = vpack.c.bf16 %v2619_v12, %v2618_v10 }
0x2bb0   :  { %v2499_v24 = vpop.permute.xlu1 %2498 }
0x2bb1   :  { %3439 = vmatmul.mubr.msk.f32.vlgmr.msra.gmra.mrb[26].mxu0 %vm341_vm7, %v2499_v24  ;;  %v2998_v24 = vld [vmem:[%s4552_s13] ss:$0 sm:$0xff]  ;;  %s3878_s13 = smov [#allocation2]  }
0x2bb2   :  { %3648 = vmatpush3.bf16.msra.mxu0 %v3647_v20  ;;  %3468 = vmatprep.mubr.msk.f32.mxu0 %vm3874_vm6, %v3873_v22  ;;  %s2895_s27 = sshll.u32 %s3878_s13, 4  ;;  %s2896_s27 = int_to_ptr.vmem [resolvable:$true] %s2895_s27 }
0x2bb3   :  { %3649 = vmatprep.subr.bf16.mxu0 %v3872_v15  ;;  %s3823_s6 = scalar_lea.vmem %s2896_s27, 32  ;;  %p3828_p1 = scmp.lt.s32.totalorder %s2896_s27, %s2896_s27 }
0x2bb4   :  { %p3824_p0 = scmp.ne.s32.totalorder %s2896_s27, %s3823_s6  ;;  %p3829_p2 = scmp.lt.s32.totalorder %s3823_s6, %s3823_s6 }
0x2bb6   :  { %3651 = vmatpush3.bf16.msra.mxu0 %v3650_v25  ;;  %p3830_p3 = por %p3829_p2, %p3828_p1 }
0x2bb7   :  { %3652 = vmatprep.subr.bf16.mxu0 %v3872_v15 }
0x2bb8   :  { %p3831_p4 = pnand %p3830_p3, %p3824_p0 }
0x2bba   :  { %3654 = vmatpush3.bf16.msra.mxu0 %v3653_v28 }
0x2bbb   :  { %3655 = vmatprep.subr.bf16.mxu0 %v3872_v15 }
0x2bbe   :  { %3657 = vmatpush3.bf16.msra.mxu0 %v3656_v31 }
0x2bc1   :  { %3469 = vmatmul.mubr.msk.f32.vlgmr.msra.gmra.mrb[28].mxu0 %vm765_vm3, %v4235_v19 }
0x2c84   :  { %v2568_v34 = vpop.f32.mrb[26].mxu0 }
0x2c85   :  { %v2573_v54 = vrot.slane %v2568_v34, 2  ;;  %v3440_v36 = vpop.f32.mrb[27].mxu0 }
0x2c87   :  { %v2575_v37 = vadd.f32 %v2573_v54, %v4079_v57 }
0x2c89   :  { %v2994_v38 = vmul.f32 -1.442695, %v2575_v37 }
0x2c8b   :  { %3805 = vpow2.f32 %v2994_v38 }
0x2c8c   :  { %3807 = vtanh.f32 %v2575_v37 }
0x2c94   :  { %v4457_v40 = vpop.f32.mrb[28].mxu0 }
0x2c95   :  { %v3806_v46 = vpop.eup %3805  ;;  %v3470_v19 = vpop.f32.mrb[29].mxu0 }
0x2c96   :  { %v2580_v42 = vadd.f32 1.0, %v3806_v46  ;;  %v3808_v50 = vpop.eup %3807 }
0x2c98   :  { %3809 = vrcp.f32 %v2580_v42 }
0x2c99   :  { %3811 = vrcp.f32 %v418_v41 }
0x2c9a   :  { %3813 = vtanh.f32 %v411_v33  ;;  %v2867_v33 = vld [vmem:[%s4541_s2] sm:$0x3] }
0x2ca2   :  { %v3810_v49 = vpop.eup %3809 }
0x2ca3   :  { %v2583_v43 = vsel %vm4088_vm10, %v3808_v50, %v3810_v49  ;;  %v3812_v57 = vpop.eup %3811 }
0x2ca4   :  { %2589 = vrot.lane.b32.xlu0 %v2583_v43, %s3875_s7  ;;  %v3814_v44 = vpop.eup %3813  ;;  %v2587_v56 = vmul.f32 %v2585_v55, %v2583_v43 }
0x2ca5   :  { %v421_v45 = vsel %vm4088_vm10, %v3814_v44, %v3812_v57 }
0x2ca8   :  { %423 = vrot.lane.b32.xlu0 %v421_v45, %s3875_s7 }
0x2d16   :  { %v2590_v47 = vpop.permute.xlu0 %2589 }
0x2d17   :  { %v2592_v48 = vmul.f32 %v2590_v47, %v2583_v43 }
0x2d19   :  { %2594 = vrot.lane.b32.xlu1 %v2592_v48, %s3876_s29 }
0x2d1a   :  { %v424_v51 = vpop.permute.xlu0 %423 }
0x2d1b   :  { %v426_v52 = vmul.f32 %v424_v51, %v421_v45 }
0x2d1d   :  { %3815 = vtanh.f32 %v426_v52 }
0x2d27   :  { %v3816_v53 = vpop.eup %3815 }
0x2d28   :  { %429 = vrot.lane.b32.xlu0 %v3816_v53, %s3877_s9 }
0x2d8b   :  { %v2595_v58 = vpop.permute.xlu1 %2594 }
0x2d8c   :  { %v2597_v61 = vadd.f32 %v2595_v58, %v2587_v56 }
0x2d8e   :  { %3817 = vtanh.f32 %v2597_v61 }
0x2d98   :  { %v3818_v60 = vpop.eup %3817 }
0x2d99   :  { %2600 = vrot.lane.b32.xlu1 %v3818_v60, %s3875_s7 }
0x2d9a   :  { %v430_v11 = vpop.permute.xlu0 %429 }
0x2d9b   :  { %v432_v3 = vmul.f32 %v430_v11, %v421_v45 }
0x2d9d   :  { %2770 = vrot.lane.b32.xlu0 %v432_v3, %s3876_s29 }
0x2e0b   :  { %v2601_v59 = vpop.permute.xlu1 %2600 }
0x2e0c   :  { %v2603_v4 = vmul.f32 %v2601_v59, %v2583_v43 }
0x2e0e   :  { %v2621_v6 = vrot.slane %v2603_v4, 6 }
0x2e0f   :  { %v2771_v16 = vpop.permute.xlu0 %2770 }
0x2e10   :  { %2622 = vrot.lane.b32.xlu1 %v2621_v6, %s3876_s29 }
0x2e82   :  { %v2623_v13 = vpop.permute.xlu1 %2622 }
0x2e83   :  { %3450 = vmatmul.mubr.msk.f32.vlgmr.msra.gmra.mrb[22].mxu1 %vm341_vm7, %v2623_v13 }
0x2e84   :  { %3660 = vmatpush3.bf16.msra.mxu1 %v3659_v9  ;;  %3479 = vmatprep.mubr.msk.f32.mxu1 %vm3874_vm6, %v3873_v22 }
0x2e85   :  { %3661 = vmatprep.subr.bf16.mxu1 %v3872_v15 }
0x2e88   :  { %3663 = vmatpush3.bf16.msra.mxu1 %v3662_v14 }
0x2e8b   :  { %3480 = vmatmul.mubr.msk.f32.vlgmr.msra.gmra.mrb[24].mxu1 %vm341_vm7, %v2771_v16 }
0x2f56   :  { %v2692_v18 = vpop.f32.mrb[22].mxu1 }
0x2f57   :  { %v2766_v20 = vadd.f32 %v4457_v40, %v2692_v18  ;;  %v3451_v21 = vpop.f32.mrb[23].mxu1 }
0x2f5e   :  { %v2840_v23 = vpop.f32.mrb[24].mxu1 }
0x2f5f   :  { %v2844_v25 = vadd.f32 %v2840_v23, %v2766_v20  ;;  %v3481_v26 = vpop.f32.mrb[25].mxu1 }
0x2f61   :  { %v2852_v27 = vadd.f32 %v2998_v24, %v2844_v25 }
0x2f63   :  { %v2855_v28 = vsel %vm2853_vm5, %v2852_v27, -inf  ;;  %2854 = vst.msk [vmem:[#allocation2] sm:$0x3] %vm2853_vm5, %v2852_v27 }
0x2f64   :  { %2856 = vmax.xlane.f32.xlu1 %v2855_v28 }
0x2ff1   :  { %v2857_v15 = vpop.xlane.xlu1 %2856 }
0x2ff2   :  { %v2858_v29 = vsub.f32 %v2852_v27, %v2857_v15 }
0x2ff4   :  { %v2859_v30 = vmul.f32 1.442695, %v2858_v29 }
0x2ff6   :  { %3819 = vpow2.f32 %v2859_v30 }
0x3000   :  { %v3820_v31 = vpop.eup %3819 }
0x3001   :  { %v2861_v32 = vsel %vm2853_vm5, %v3820_v31, 0.0 }
0x3002   :  { %2862 = vadd.xlane.f32.xlu0 %v2861_v32 }
0x3018   :  { %2869 = vperm.xlu0 %3681, %v2867_v33  }
0x308f   :  { %v2863_v34 = vpop.xlane.xlu0 %2862 }
0x3090   :  { %3821 = vlog2.f32 %v2863_v34 }
0x3097   :  { %v2870_v35 = vpop.permute.xlu0 %2869 }
0x3098   :  { %vm2871_vm6 = vcmp.eq.s32.totalorder %v3996_v17, %v2870_v35 }
0x3099   :  { %v2999_v38 = vsel %vm2871_vm6, 1.0, %v3873_v22 }
0x309a   :  { %v3822_v54 = vpop.eup %3821 }
0x309b   :  { %v2865_v36 = vmul.f32 0.6931472, %v3822_v54 }
0x309d   :  { %v2866_v37 = vsub.f32 %v2858_v29, %v2865_v36 }
0x309f   :  { %v2874_v39 = vmul.f32 %v2999_v38, %v2866_v37 }
0x30a1   :  { %v2875_v40 = vsel %vm2853_vm5, %v2874_v39, 0.0 }
0x30a2   :  { %2876 = vadd.xlane.f32.xlu1 %v2875_v40 }
0x30a3   :  { %3834 = shalt.err (!%p3831_p4)
}
0x30a4   :  { %s3835_s30 = scalar_lea.hbm %s4553_s14, 32 }
0x30a5   :  { %p3836_p5 = scmp.ne.s32.totalorder %s4553_s14, %s3835_s30  ;;  %p3839_p6 = scmp.lt.u32.totalorder %s3835_s30, %s4553_s14 }
0x30a7   :  { %p3841_p7 = pnand %p3839_p6, %p3836_p5 }
0x30a9   :  { %3844 = shalt.err (!%p3841_p7)
}
0x30aa   :  { %2898 = dma.vmem_to_hbm [thread:$0]  %s2896_s27, 32, %s4553_s14, [#allocation3]   ;;  %vm2887_vm7 = vcmask 0  }
0x30ab   :  { %s3879_s10 = smov [#allocation4]  }
0x30ac   :  { %s2905_s19 = sshll.u32 %s3879_s10, 4  ;;  %s2906_s19 = int_to_ptr.vmem [resolvable:$true] %s2905_s19 }
0x30ad   :  { %s3845_s11 = scalar_lea.vmem %s2906_s19, 16  ;;  %s3849_s20 = scalar_lea.vmem %s2906_s19, 32 }
0x30ae   :  { %p3846_p8 = scmp.ne.s32.totalorder %s2906_s19, %s3845_s11  ;;  %p3850_p9 = scmp.lt.s32.totalorder %s2906_s19, %s2906_s19 }
0x30af   :  { %p3851_p10 = scmp.lt.s32.totalorder %s3849_s20, %s3845_s11 }
0x30b1   :  { %p3852_p11 = por %p3851_p10, %p3850_p9 }
0x30b3   :  { %p3853_p12 = pnand %p3852_p11, %p3846_p8 }
0x312f   :  { %v2877_v17 = vpop.xlane.xlu1 %2876 }
0x3130   :  { %v2878_v22 = vsub.f32 0.0, %v2877_v17 }
0x3132   :  { %v2879_v46 = vsel %vm129_vm0, %v2878_v22, 0.0 }
0x3133   :  { %v2880_v19 = vrot.slane %v2879_v46, 4 }
0x3135   :  { %v2881_v41 = vadd.f32 %v2880_v19, %v2879_v46 }
0x3137   :  { %v2882_v42 = vrot.slane %v2881_v41, 2 }
0x3139   :  { %v2883_v50 = vadd.f32 %v2882_v42, %v2881_v41 }
0x313b   :  { %v2884_v49 = vrot.slane %v2883_v50, 1 }
0x313d   :  { %v2885_v43 = vadd.f32 %v2884_v49, %v2883_v50 }
0x313f   :  { %v2886_v57 = vmul.f32 0.5, %v2885_v43 }
0x3141   :  { %2888 = vst.msk [vmem:[#allocation4] sm:$0x1] %vm2887_vm7, %v2886_v57 }
0x3142   :  { %3856 = shalt.err (!%p3853_p12)
}
0x3143   :  { %s3857_s21 = scalar_lea.hbm %s4554_s15, 16 }
0x3144   :  { %p3858_p13 = scmp.ne.s32.totalorder %s4554_s15, %s3857_s21  ;;  %p3861_p0 = scmp.lt.u32.totalorder %s3857_s21, %s4554_s15 }
0x3146   :  { %p3863_p1 = pnand %p3861_p0, %p3858_p13 }
0x3148   :  { %3866 = shalt.err (!%p3863_p1)
}
0x3149   :  { %2908 = dma.vmem_to_hbm [thread:$0]  %s2906_s19, 16, %s4554_s15, [#allocation5]  }
0x314a   :  { %3867 = dma.done.wait [#allocation3], 32  }
0x314b   :  { %3868 = vsyncadd [#allocation3], 4294967264 }
0x314c   :  { %3869 = dma.done.wait [#allocation5], 16  }
0x314d   :  { %3870 = vsyncadd [#allocation5], 4294967280 }
0x314e   :  { %2915 = vsyncpa [#allocation3], 1 }
0x314f   :  { %2916 = vsyncpa [#allocation5], 1 }

</bundles_post_ra>
